<compile_context>
chip_gen: v7x
topology: tpu7x:2x2x1
jax: 0.10.0
libtpu: 0.0.40
codegen_flags: <defaults>
</compile_context>

<pallas_src>
import functools

import jax
import jax.numpy as jnp
from jax import lax
from jax.experimental import pallas as pl
from jax.experimental.pallas import tpu as pltpu


# ---------------------------------------------------------------------------
# The single fused Pallas kernel
# ---------------------------------------------------------------------------
def _fused_forward_kernel(slab_ref, w1_ref, w2_ref, g_ref, b_ref, w3_ref,
                          o_ref, y1s_ref, *, clip, n_batch, n_taps, slope, eps):
    f32 = jnp.float32
    ndf = w1_ref.shape[0]              # 8
    m = y1s_ref.shape[1]               # N * h2 * w2 = 32
    kk = w3_ref.shape[1]               # 16 = h2*w2 final-conv taps

    # ---- layer-1 weights: W1' = clip * sin(W1)  (EUP) ----------------------
    w1s = clip * jnp.sin(w1_ref[...])                              # (ndf, 64)

    # ---- conv1 over all 16 conv2-taps at once: one lane-dense MXU GEMM -----
    # slab columns are ordered (tap, n, oh2, ow2); columns are zero where
    # conv2's padding falls outside conv1's 8x8 output grid (valid because
    # conv1 is bias-free and LeakyReLU(0) == 0).
    y1 = lax.dot_general(w1s, slab_ref[...], (((1,), (0,)), ((), ())),
                         preferred_element_type=f32)               # (ndf, 512)
    y1 = jnp.where(y1 > 0, y1, slope * y1)                         # LeakyReLU

    # ---- regroup (c1; tap, m) -> (tap, c1; m) via aligned sublane-tile
    # stores into VMEM scratch (each store is one full (8, m) tile row). -----
    for t in range(n_taps):
        y1s_ref[pl.ds(t * ndf, ndf), :] = y1[:, t * m:(t + 1) * m]

    # ---- conv2: one GEMM, contraction K = n_taps * ndf = 128 ---------------
    w2s = clip * jnp.sin(w2_ref[...])                              # (cndf, 128), cols (ki,kj,c1)
    acc = lax.dot_general(w2s, y1s_ref[...], (((1,), (0,)), ((), ())),
                          preferred_element_type=f32)              # (cndf, m)

    # ---- BatchNorm2d_S1 (training mode: biased batch stats over N*H*W),
    # single pass: var = E[x^2] - mean^2;  gamma/beta = clip*sin(.) ----------
    inv_m = 1.0 / m
    s1 = jnp.sum(acc, axis=1, keepdims=True)                       # (cndf, 1)
    s2 = jnp.sum(acc * acc, axis=1, keepdims=True)                 # (cndf, 1)
    mean = s1 * inv_m
    var = s2 * inv_m - mean * mean
    gamma = clip * jnp.sin(g_ref[...])                             # (cndf, 1)
    beta = clip * jnp.sin(b_ref[...])                              # (cndf, 1)
    y2 = (acc - mean) * lax.rsqrt(var + eps) * gamma + beta
    y2 = jnp.where(y2 > 0, y2, slope * y2)                         # (cndf, m)

    # ---- final 4x4 valid conv (cndf -> 1) fused with the batch mean:
    # out = (1/N) * sum_{c2, n, p} W3'[c2, p] * y2[c2, n*kk + p]
    # done as elementwise multiply + reduce on the VPU (no MXU, no iota mask).
    y2b = y2[:, 0:kk]
    for n in range(1, n_batch):
        y2b = y2b + y2[:, n * kk:(n + 1) * kk]                     # (cndf, kk)
    w3s = clip * jnp.sin(w3_ref[...])                              # (cndf, kk)
    tot = jnp.sum(y2b * w3s, axis=1, keepdims=True)                # (cndf, 1)
    tot = jnp.sum(tot, axis=0, keepdims=True)                      # (1, 1)
    o_ref[...] = (tot * (1.0 / n_batch)).astype(o_ref.dtype)


# ---------------------------------------------------------------------------
# Host glue: build the tap-major slab (one small fused XLA op under jit).
# slab[k1, (tap, n, oh2, ow2)] = conv1 im2col patch element k1=(ci,ki1,kj1)
# at the conv1-output position read by conv2 tap (ki,kj) for output (oh2,ow2);
# zero where conv2's padding falls outside conv1's output grid.
# ---------------------------------------------------------------------------
def _build_tap_slab(x, ksize=4, stride=2, pad=1):
    N, C, H, W = x.shape
    h1 = (H + 2 * pad - ksize) // stride + 1          # 8
    w1 = (W + 2 * pad - ksize) // stride + 1          # 8
    xp = jnp.pad(x, ((0, 0), (0, 0), (pad, pad), (pad, pad)))
    cols = []
    for i in range(ksize):
        for j in range(ksize):
            cols.append(xp[:, :, i:i + stride * h1:stride, j:j + stride * w1:stride])
    # (N, C, 16, h1, w1) -> (N, K1, h1, w1), K1 index = (ci, ki1, kj1)
    col = jnp.stack(cols, axis=2).reshape(N, C * ksize * ksize, h1, w1)

    h2 = (h1 + 2 * pad - ksize) // stride + 1         # 4
    w2 = (w1 + 2 * pad - ksize) // stride + 1         # 4
    p1p = jnp.pad(col, ((0, 0), (0, 0), (pad, pad), (pad, pad)))
    taps = []
    for i in range(ksize):
        for j in range(ksize):
            taps.append(p1p[:, :, i:i + stride * h2:stride, j:j + stride * w2:stride])
    t = jnp.stack(taps, axis=0)                       # (16, N, K1, h2, w2), tap = ki*4+kj
    k1 = C * ksize * ksize
    slab = t.transpose(2, 0, 1, 3, 4).reshape(k1, ksize * ksize * N * h2 * w2)
    return slab, h2, w2


def dcgan_d_lie_forward(x, params, *, clip):
    N = x.shape[0]
    ndf = params["w1"].shape[0]
    cndf = params["w2"].shape[0]
    kk = params["w3"].shape[2] * params["w3"].shape[3]           # 16 final taps
    n_taps = 16

    slab, h2, w2sz = _build_tap_slab(x)
    assert (h2, w2sz) == (4, 4), "final conv expects a 4x4 feature map"
    m = N * h2 * w2sz

    # raw weights; clip*sin and the GEMM layouts are handled inside the kernel
    w1r = params["w1"].reshape(ndf, -1)                          # (ndf, 64), cols (ci,ki1,kj1)
    w2r = params["w2"].transpose(0, 2, 3, 1).reshape(cndf, -1)   # (cndf, 128), cols (ki,kj,c1)
    g = params["gamma"].reshape(cndf, 1)
    b = params["beta"].reshape(cndf, 1)
    w3r = params["w3"].reshape(cndf, kk)                         # (cndf, 16), cols i*4+j
    assert w2r.shape[1] == n_taps * ndf

    vmem = pl.BlockSpec(memory_space=pltpu.MemorySpace.VMEM)
    out = pl.pallas_call(
        functools.partial(_fused_forward_kernel, clip=clip, n_batch=N,
                          n_taps=n_taps, slope=0.2, eps=1e-5),
        out_shape=jax.ShapeDtypeStruct((1, 1), jnp.float32),
        in_specs=[vmem] * 6,
        out_specs=vmem,
        scratch_shapes=[pltpu.VMEM((n_taps * ndf, m), jnp.float32)],
        cost_estimate=pl.CostEstimate(flops=700_000, transcendentals=3_000,
                                      bytes_accessed=150_000),
    )(slab, w1r, w2r, g, b, w3r)
    return out.reshape(1)


# ---------------------------------------------------------------------------
# Pure-JAX reference (correctness check only)
# ---------------------------------------------------------------------------
def reference_forward(x, params, *, clip):
    def conv(x, w, stride, pad):
        return lax.conv_general_dilated(
            x, clip * jnp.sin(w), (stride, stride), [(pad, pad), (pad, pad)],
            dimension_numbers=("NCHW", "OIHW", "NCHW"))

    y = conv(x, params["w1"], 2, 1)
    y = jnp.where(y > 0, y, 0.2 * y)
    y = conv(y, params["w2"], 2, 1)
    mean = jnp.mean(y, axis=(0, 2, 3), keepdims=True)
    var = jnp.mean((y - mean) ** 2, axis=(0, 2, 3), keepdims=True)
    g = (clip * jnp.sin(params["gamma"])).reshape(1, -1, 1, 1)
    b = (clip * jnp.sin(params["beta"])).reshape(1, -1, 1, 1)
    y = (y - mean) * lax.rsqrt(var + 1e-5) * g + b
    y = jnp.where(y > 0, y, 0.2 * y)
    y = conv(y, params["w3"], 1, 0)                              # (N, 1, 1, 1)
    return jnp.mean(y, axis=0).reshape(1)


if __name__ == "__main__":
    key = jax.random.PRNGKey(0)
    k_x, k1, k2, k3, k4, k5 = jax.random.split(key, 6)

    isize, nc, ndf, N = 16, 4, 8, 2
    clip = 0.8

    x = jax.random.normal(k_x, (N, nc, isize, isize), dtype=jnp.float32)
    params = {
        "w1": 0.1 * jax.random.normal(k1, (ndf, nc, 4, 4), dtype=jnp.float32),
        "w2": 0.1 * jax.random.normal(k2, (2 * ndf, ndf, 4, 4), dtype=jnp.float32),
        "gamma": 1.0 + 0.1 * jax.random.normal(k3, (2 * ndf,), dtype=jnp.float32),
        "beta": 0.1 * jax.random.normal(k4, (2 * ndf,), dtype=jnp.float32),
        "w3": 0.1 * jax.random.normal(k5, (1, 2 * ndf, 4, 4), dtype=jnp.float32),
    }

    fwd = jax.jit(functools.partial(dcgan_d_lie_forward, clip=clip))
    out = jax.block_until_ready(fwd(x, params))
    ref = jax.block_until_ready(reference_forward(x, params, clip=clip))

    assert out.shape == (1,), out.shape
    assert jnp.allclose(out, ref, rtol=1e-2, atol=1e-3), (out, ref)
    print("KERNEL_OK")
</pallas_src>

<mosaic_0001>
module attributes {stable_mosaic.version = 11 : i64} {
  func.func @_fused_forward_kernel(%arg0: memref<64x512xf32, #tpu.memory_space<vmem>>, %arg1: memref<8x64xf32, #tpu.memory_space<vmem>>, %arg2: memref<16x128xf32, #tpu.memory_space<vmem>>, %arg3: memref<16x1xf32, #tpu.memory_space<vmem>>, %arg4: memref<16x1xf32, #tpu.memory_space<vmem>>, %arg5: memref<16x16xf32, #tpu.memory_space<vmem>>, %arg6: memref<1x1xf32, #tpu.memory_space<vmem>>, %arg7: memref<128x32xf32, #tpu.memory_space<vmem>>) attributes {dimension_semantics = [], scalar_prefetch = 0 : i64, scratch_operands = 1 : i64, tpu.core_type = #tpu.core_type<tc>} {
    %c0 = arith.constant 0 : index
    %c0_0 = arith.constant 0 : index
    %0 = vector.load %arg1[%c0, %c0_0] : memref<8x64xf32, #tpu.memory_space<vmem>>, vector<8x64xf32>
    %1 = math.sin %0 : vector<8x64xf32>
    %cst = arith.constant 8.000000e-01 : f32
    %2 = vector.broadcast %cst : f32 to vector<8x64xf32>
    %3 = arith.mulf %2, %1 : vector<8x64xf32>
    %c0_1 = arith.constant 0 : index
    %c0_2 = arith.constant 0 : index
    %4 = vector.load %arg0[%c0_1, %c0_2] : memref<64x512xf32, #tpu.memory_space<vmem>>, vector<64x512xf32>
    %cst_3 = arith.constant dense<0.000000e+00> : vector<8x512xf32>
    %5 = tpu.matmul %3, %4, %cst_3 {dimension_numbers = #tpu.dot_dimension_numbers<[1], [0], [0], [1], [0, 0, 1, 1], [], []>} : vector<8x64xf32>, vector<64x512xf32>, vector<8x512xf32> -> vector<8x512xf32>
    %cst_4 = arith.constant 0.000000e+00 : f32
    %6 = vector.broadcast %cst_4 : f32 to vector<8x512xf32>
    %7 = arith.cmpf ogt, %5, %6 : vector<8x512xf32>
    %cst_5 = arith.constant 2.000000e-01 : f32
    %8 = vector.broadcast %cst_5 : f32 to vector<8x512xf32>
    %9 = arith.mulf %8, %5 : vector<8x512xf32>
    %10 = arith.select %7, %5, %9 : vector<8x512xi1>, vector<8x512xf32>
    %11 = vector.extract_strided_slice %10 {offsets = [0, 0], sizes = [8, 32], strides = [1, 1]} : vector<8x512xf32> to vector<8x32xf32>
    %c0_6 = arith.constant 0 : index
    %c0_7 = arith.constant 0 : index
    %12 = vector.load %arg7[%c0_6, %c0_7] : memref<128x32xf32, #tpu.memory_space<vmem>>, vector<8x32xf32>
    tpu.vector_store %arg7[%c0_6, %c0_7], %11 {strides = array<i32>} : memref<128x32xf32, #tpu.memory_space<vmem>>, vector<8x32xf32>,
    %13 = vector.extract_strided_slice %10 {offsets = [0, 32], sizes = [8, 32], strides = [1, 1]} : vector<8x512xf32> to vector<8x32xf32>
    %c8 = arith.constant 8 : index
    %c0_8 = arith.constant 0 : index
    %14 = vector.load %arg7[%c8, %c0_8] : memref<128x32xf32, #tpu.memory_space<vmem>>, vector<8x32xf32>
    tpu.vector_store %arg7[%c8, %c0_8], %13 {strides = array<i32>} : memref<128x32xf32, #tpu.memory_space<vmem>>, vector<8x32xf32>,
    %15 = vector.extract_strided_slice %10 {offsets = [0, 64], sizes = [8, 32], strides = [1, 1]} : vector<8x512xf32> to vector<8x32xf32>
    %c16 = arith.constant 16 : index
    %c0_9 = arith.constant 0 : index
    %16 = vector.load %arg7[%c16, %c0_9] : memref<128x32xf32, #tpu.memory_space<vmem>>, vector<8x32xf32>
    tpu.vector_store %arg7[%c16, %c0_9], %15 {strides = array<i32>} : memref<128x32xf32, #tpu.memory_space<vmem>>, vector<8x32xf32>,
    %17 = vector.extract_strided_slice %10 {offsets = [0, 96], sizes = [8, 32], strides = [1, 1]} : vector<8x512xf32> to vector<8x32xf32>
    %c24 = arith.constant 24 : index
    %c0_10 = arith.constant 0 : index
    %18 = vector.load %arg7[%c24, %c0_10] : memref<128x32xf32, #tpu.memory_space<vmem>>, vector<8x32xf32>
    tpu.vector_store %arg7[%c24, %c0_10], %17 {strides = array<i32>} : memref<128x32xf32, #tpu.memory_space<vmem>>, vector<8x32xf32>,
    %19 = vector.extract_strided_slice %10 {offsets = [0, 128], sizes = [8, 32], strides = [1, 1]} : vector<8x512xf32> to vector<8x32xf32>
    %c32 = arith.constant 32 : index
    %c0_11 = arith.constant 0 : index
    %20 = vector.load %arg7[%c32, %c0_11] : memref<128x32xf32, #tpu.memory_space<vmem>>, vector<8x32xf32>
    tpu.vector_store %arg7[%c32, %c0_11], %19 {strides = array<i32>} : memref<128x32xf32, #tpu.memory_space<vmem>>, vector<8x32xf32>,
    %21 = vector.extract_strided_slice %10 {offsets = [0, 160], sizes = [8, 32], strides = [1, 1]} : vector<8x512xf32> to vector<8x32xf32>
    %c40 = arith.constant 40 : index
    %c0_12 = arith.constant 0 : index
    %22 = vector.load %arg7[%c40, %c0_12] : memref<128x32xf32, #tpu.memory_space<vmem>>, vector<8x32xf32>
    tpu.vector_store %arg7[%c40, %c0_12], %21 {strides = array<i32>} : memref<128x32xf32, #tpu.memory_space<vmem>>, vector<8x32xf32>,
    %23 = vector.extract_strided_slice %10 {offsets = [0, 192], sizes = [8, 32], strides = [1, 1]} : vector<8x512xf32> to vector<8x32xf32>
    %c48 = arith.constant 48 : index
    %c0_13 = arith.constant 0 : index
    %24 = vector.load %arg7[%c48, %c0_13] : memref<128x32xf32, #tpu.memory_space<vmem>>, vector<8x32xf32>
    tpu.vector_store %arg7[%c48, %c0_13], %23 {strides = array<i32>} : memref<128x32xf32, #tpu.memory_space<vmem>>, vector<8x32xf32>,
    %25 = vector.extract_strided_slice %10 {offsets = [0, 224], sizes = [8, 32], strides = [1, 1]} : vector<8x512xf32> to vector<8x32xf32>
    %c56 = arith.constant 56 : index
    %c0_14 = arith.constant 0 : index
    %26 = vector.load %arg7[%c56, %c0_14] : memref<128x32xf32, #tpu.memory_space<vmem>>, vector<8x32xf32>
    tpu.vector_store %arg7[%c56, %c0_14], %25 {strides = array<i32>} : memref<128x32xf32, #tpu.memory_space<vmem>>, vector<8x32xf32>,
    %27 = vector.extract_strided_slice %10 {offsets = [0, 256], sizes = [8, 32], strides = [1, 1]} : vector<8x512xf32> to vector<8x32xf32>
    %c64 = arith.constant 64 : index
    %c0_15 = arith.constant 0 : index
    %28 = vector.load %arg7[%c64, %c0_15] : memref<128x32xf32, #tpu.memory_space<vmem>>, vector<8x32xf32>
    tpu.vector_store %arg7[%c64, %c0_15], %27 {strides = array<i32>} : memref<128x32xf32, #tpu.memory_space<vmem>>, vector<8x32xf32>,
    %29 = vector.extract_strided_slice %10 {offsets = [0, 288], sizes = [8, 32], strides = [1, 1]} : vector<8x512xf32> to vector<8x32xf32>
    %c72 = arith.constant 72 : index
    %c0_16 = arith.constant 0 : index
    %30 = vector.load %arg7[%c72, %c0_16] : memref<128x32xf32, #tpu.memory_space<vmem>>, vector<8x32xf32>
    tpu.vector_store %arg7[%c72, %c0_16], %29 {strides = array<i32>} : memref<128x32xf32, #tpu.memory_space<vmem>>, vector<8x32xf32>,
    %31 = vector.extract_strided_slice %10 {offsets = [0, 320], sizes = [8, 32], strides = [1, 1]} : vector<8x512xf32> to vector<8x32xf32>
    %c80 = arith.constant 80 : index
    %c0_17 = arith.constant 0 : index
    %32 = vector.load %arg7[%c80, %c0_17] : memref<128x32xf32, #tpu.memory_space<vmem>>, vector<8x32xf32>
    tpu.vector_store %arg7[%c80, %c0_17], %31 {strides = array<i32>} : memref<128x32xf32, #tpu.memory_space<vmem>>, vector<8x32xf32>,
    %33 = vector.extract_strided_slice %10 {offsets = [0, 352], sizes = [8, 32], strides = [1, 1]} : vector<8x512xf32> to vector<8x32xf32>
    %c88 = arith.constant 88 : index
    %c0_18 = arith.constant 0 : index
    %34 = vector.load %arg7[%c88, %c0_18] : memref<128x32xf32, #tpu.memory_space<vmem>>, vector<8x32xf32>
    tpu.vector_store %arg7[%c88, %c0_18], %33 {strides = array<i32>} : memref<128x32xf32, #tpu.memory_space<vmem>>, vector<8x32xf32>,
    %35 = vector.extract_strided_slice %10 {offsets = [0, 384], sizes = [8, 32], strides = [1, 1]} : vector<8x512xf32> to vector<8x32xf32>
    %c96 = arith.constant 96 : index
    %c0_19 = arith.constant 0 : index
    %36 = vector.load %arg7[%c96, %c0_19] : memref<128x32xf32, #tpu.memory_space<vmem>>, vector<8x32xf32>
    tpu.vector_store %arg7[%c96, %c0_19], %35 {strides = array<i32>} : memref<128x32xf32, #tpu.memory_space<vmem>>, vector<8x32xf32>,
    %37 = vector.extract_strided_slice %10 {offsets = [0, 416], sizes = [8, 32], strides = [1, 1]} : vector<8x512xf32> to vector<8x32xf32>
    %c104 = arith.constant 104 : index
    %c0_20 = arith.constant 0 : index
    %38 = vector.load %arg7[%c104, %c0_20] : memref<128x32xf32, #tpu.memory_space<vmem>>, vector<8x32xf32>
    tpu.vector_store %arg7[%c104, %c0_20], %37 {strides = array<i32>} : memref<128x32xf32, #tpu.memory_space<vmem>>, vector<8x32xf32>,
    %39 = vector.extract_strided_slice %10 {offsets = [0, 448], sizes = [8, 32], strides = [1, 1]} : vector<8x512xf32> to vector<8x32xf32>
    %c112 = arith.constant 112 : index
    %c0_21 = arith.constant 0 : index
    %40 = vector.load %arg7[%c112, %c0_21] : memref<128x32xf32, #tpu.memory_space<vmem>>, vector<8x32xf32>
    tpu.vector_store %arg7[%c112, %c0_21], %39 {strides = array<i32>} : memref<128x32xf32, #tpu.memory_space<vmem>>, vector<8x32xf32>,
    %41 = vector.extract_strided_slice %10 {offsets = [0, 480], sizes = [8, 32], strides = [1, 1]} : vector<8x512xf32> to vector<8x32xf32>
    %c120 = arith.constant 120 : index
    %c0_22 = arith.constant 0 : index
    %42 = vector.load %arg7[%c120, %c0_22] : memref<128x32xf32, #tpu.memory_space<vmem>>, vector<8x32xf32>
    tpu.vector_store %arg7[%c120, %c0_22], %41 {strides = array<i32>} : memref<128x32xf32, #tpu.memory_space<vmem>>, vector<8x32xf32>,
    %c0_23 = arith.constant 0 : index
    %c0_24 = arith.constant 0 : index
    %43 = vector.load %arg2[%c0_23, %c0_24] : memref<16x128xf32, #tpu.memory_space<vmem>>, vector<16x128xf32>
    %44 = math.sin %43 : vector<16x128xf32>
    %cst_25 = arith.constant 8.000000e-01 : f32
    %45 = vector.broadcast %cst_25 : f32 to vector<16x128xf32>
    %46 = arith.mulf %45, %44 : vector<16x128xf32>
    %c0_26 = arith.constant 0 : index
    %c0_27 = arith.constant 0 : index
    %47 = vector.load %arg7[%c0_26, %c0_27] : memref<128x32xf32, #tpu.memory_space<vmem>>, vector<128x32xf32>
    %cst_28 = arith.constant dense<0.000000e+00> : vector<16x32xf32>
    %48 = tpu.matmul %46, %47, %cst_28 {dimension_numbers = #tpu.dot_dimension_numbers<[1], [0], [0], [1], [0, 0, 1, 1], [], []>} : vector<16x128xf32>, vector<128x32xf32>, vector<16x32xf32> -> vector<16x32xf32>
    %cst_29 = arith.constant dense<0.000000e+00> : vector<16xf32>
    %49 = vector.multi_reduction <add>, %48, %cst_29 [1] : vector<16x32xf32> to vector<16xf32>
    %50 = vector.shape_cast %49 : vector<16xf32> to vector<16x1xf32>
    %51 = arith.mulf %48, %48 : vector<16x32xf32>
    %cst_30 = arith.constant dense<0.000000e+00> : vector<16xf32>
    %52 = vector.multi_reduction <add>, %51, %cst_30 [1] : vector<16x32xf32> to vector<16xf32>
    %53 = vector.shape_cast %52 : vector<16xf32> to vector<16x1xf32>
    %cst_31 = arith.constant 3.125000e-02 : f32
    %54 = vector.broadcast %cst_31 : f32 to vector<16x1xf32>
    %55 = arith.mulf %50, %54 : vector<16x1xf32>
    %cst_32 = arith.constant 3.125000e-02 : f32
    %56 = vector.broadcast %cst_32 : f32 to vector<16x1xf32>
    %57 = arith.mulf %53, %56 : vector<16x1xf32>
    %58 = arith.mulf %55, %55 : vector<16x1xf32>
    %59 = arith.subf %57, %58 : vector<16x1xf32>
    %c0_33 = arith.constant 0 : index
    %c0_34 = arith.constant 0 : index
    %60 = vector.load %arg3[%c0_33, %c0_34] : memref<16x1xf32, #tpu.memory_space<vmem>>, vector<16x1xf32>
    %61 = math.sin %60 : vector<16x1xf32>
    %cst_35 = arith.constant 8.000000e-01 : f32
    %62 = vector.broadcast %cst_35 : f32 to vector<16x1xf32>
    %63 = arith.mulf %62, %61 : vector<16x1xf32>
    %c0_36 = arith.constant 0 : index
    %c0_37 = arith.constant 0 : index
    %64 = vector.load %arg4[%c0_36, %c0_37] : memref<16x1xf32, #tpu.memory_space<vmem>>, vector<16x1xf32>
    %65 = math.sin %64 : vector<16x1xf32>
    %cst_38 = arith.constant 8.000000e-01 : f32
    %66 = vector.broadcast %cst_38 : f32 to vector<16x1xf32>
    %67 = arith.mulf %66, %65 : vector<16x1xf32>
    %68 = vector.broadcast %55 : vector<16x1xf32> to vector<16x32xf32>
    %69 = arith.subf %48, %68 : vector<16x32xf32>
    %cst_39 = arith.constant 9.99999974E-6 : f32
    %70 = vector.broadcast %cst_39 : f32 to vector<16x1xf32>
    %71 = arith.addf %59, %70 : vector<16x1xf32>
    %72 = math.rsqrt %71 : vector<16x1xf32>
    %73 = vector.broadcast %72 : vector<16x1xf32> to vector<16x32xf32>
    %74 = arith.mulf %69, %73 : vector<16x32xf32>
    %75 = vector.broadcast %63 : vector<16x1xf32> to vector<16x32xf32>
    %76 = arith.mulf %74, %75 : vector<16x32xf32>
    %77 = vector.broadcast %67 : vector<16x1xf32> to vector<16x32xf32>
    %78 = arith.addf %76, %77 : vector<16x32xf32>
    %cst_40 = arith.constant 0.000000e+00 : f32
    %79 = vector.broadcast %cst_40 : f32 to vector<16x32xf32>
    %80 = arith.cmpf ogt, %78, %79 : vector<16x32xf32>
    %cst_41 = arith.constant 2.000000e-01 : f32
    %81 = vector.broadcast %cst_41 : f32 to vector<16x32xf32>
    %82 = arith.mulf %81, %78 : vector<16x32xf32>
    %83 = arith.select %80, %78, %82 : vector<16x32xi1>, vector<16x32xf32>
    %84 = vector.extract_strided_slice %83 {offsets = [0, 0], sizes = [16, 16], strides = [1, 1]} : vector<16x32xf32> to vector<16x16xf32>
    %85 = vector.extract_strided_slice %83 {offsets = [0, 16], sizes = [16, 16], strides = [1, 1]} : vector<16x32xf32> to vector<16x16xf32>
    %86 = arith.addf %84, %85 : vector<16x16xf32>
    %c0_42 = arith.constant 0 : index
    %c0_43 = arith.constant 0 : index
    %87 = vector.load %arg5[%c0_42, %c0_43] : memref<16x16xf32, #tpu.memory_space<vmem>>, vector<16x16xf32>
    %88 = math.sin %87 : vector<16x16xf32>
    %cst_44 = arith.constant 8.000000e-01 : f32
    %89 = vector.broadcast %cst_44 : f32 to vector<16x16xf32>
    %90 = arith.mulf %89, %88 : vector<16x16xf32>
    %91 = arith.mulf %86, %90 : vector<16x16xf32>
    %cst_45 = arith.constant dense<0.000000e+00> : vector<16xf32>
    %92 = vector.multi_reduction <add>, %91, %cst_45 [1] : vector<16x16xf32> to vector<16xf32>
    %93 = vector.shape_cast %92 : vector<16xf32> to vector<16x1xf32>
    %cst_46 = arith.constant dense<0.000000e+00> : vector<1xf32>
    %94 = vector.multi_reduction <add>, %93, %cst_46 [0] : vector<16x1xf32> to vector<1xf32>
    %95 = vector.shape_cast %94 : vector<1xf32> to vector<1x1xf32>
    %cst_47 = arith.constant 5.000000e-01 : f32
    %96 = vector.broadcast %cst_47 : f32 to vector<1x1xf32>
    %97 = arith.mulf %95, %96 : vector<1x1xf32>
    %c0_48 = arith.constant 0 : index
    %c0_49 = arith.constant 0 : index
    %98 = vector.load %arg6[%c0_48, %c0_49] : memref<1x1xf32, #tpu.memory_space<vmem>>, vector<1x1xf32>
    tpu.vector_store %arg6[%c0_48, %c0_49], %97 {strides = array<i32>} : memref<1x1xf32, #tpu.memory_space<vmem>>, vector<1x1xf32>,
    return
  }
}

</mosaic_0001>

<bundles_post_ra>
// kernel: dcgan_d_lie_forward.1
= control target key start
LH: loop header
LB: loop body
LE: loop exit
PB: predicated region body
PF: predicated region fallthrough
CT: control target
= control target key end

     0   :  { %v1689_v7 = vmov 0.0   ;;  %s2613_s0 = inlined_call_operand.vmem [shape: f32[64,512], index: 0, kind: input, shape index: {}]   ;;  %s2614_s1 = inlined_call_operand.vmem [shape: f32[8,64], index: 1, kind: input, shape index: {}]   ;;  %s2615_s2 = inlined_call_operand.vmem [shape: f32[16,128], index: 2, kind: input, shape index: {}]   ;;  %s2616_s3 = inlined_call_operand.vmem [shape: f32[16,1], index: 3, kind: input, shape index: {}]   ;;  %s2617_s4 = inlined_call_operand.vmem [shape: f32[16,1], index: 4, kind: input, shape index: {}]   ;;  %s2618_s5 = inlined_call_operand.vmem [shape: f32[16,16], index: 5, kind: input, shape index: {}]   ;;  %s2619_s6 = inlined_call_operand.hbm [shape: f32[1,1], index: 6, kind: output, shape index: {}]  }
   0x1   :  { %v131_v0 = vld [vmem:[%s2613_s0 + $0x8] sm:$0xff]  ;;  %v130_v2 = vld [vmem:[%s2613_s0] sm:$0xff]  ;;  %230 = vmatprep.mubr.f32.mxu1 %v1689_v7  ;;  %v133_v27 = vld [vmem:[%s2613_s0 + $0x18] sm:$0xff] }
   0x2   :  { %v135_v1 = vld [vmem:[%s2613_s0 + $0x28] sm:$0xff]  ;;  %v134_v4 = vld [vmem:[%s2613_s0 + $0x20] sm:$0xff]  ;;  %v137_v28 = vld [vmem:[%s2613_s0 + $0x38] sm:$0xff] }
   0x3   :  { %v1510_v3 = vpack.c.bf16 %v135_v1, %v131_v0  ;;  %v139_v5 = vld [vmem:[%s2613_s0 + $0x48] sm:$0xff]  ;;  %v1512_v8 = vpack.c.bf16 %v134_v4, %v130_v2  ;;  %v138_v10 = vld [vmem:[%s2613_s0 + $0x40] sm:$0xff] }
   0x4   :  { %v143_v6 = vld [vmem:[%s2613_s0 + $0x68] sm:$0xff]  ;;  %v142_v11 = vld [vmem:[%s2613_s0 + $0x60] sm:$0xff] }
   0x5   :  { %v1514_v9 = vpack.c.bf16 %v143_v6, %v139_v5  ;;  %v147_v12 = vld [vmem:[%s2613_s0 + $0x88] sm:$0xff]  ;;  %1511 = vmatprep.subr.bf16.mxu1 %v1510_v3  ;;  %v1516_v14 = vpack.c.bf16 %v142_v11, %v138_v10  ;;  %v146_v16 = vld [vmem:[%s2613_s0 + $0x80] sm:$0xff] }
   0x6   :  { %v151_v13 = vld [vmem:[%s2613_s0 + $0xa8] sm:$0xff]  ;;  %1513 = vmatpush1.bf16.msra.mxu1 %v1512_v8  ;;  %v150_v17 = vld [vmem:[%s2613_s0 + $0xa0] sm:$0xff] }
   0x7   :  { %1515 = vmatprep.subr.bf16.mxu1 %v1514_v9  ;;  %v1518_v15 = vpack.c.bf16 %v151_v13, %v147_v12  ;;  %v155_v18 = vld [vmem:[%s2613_s0 + $0xc8] sm:$0xff]  ;;  %v1783_v20 = vld [vmem:[%s2614_s1] sm:$0xff]  ;;  %v1520_v22 = vpack.c.bf16 %v150_v17, %v146_v16 }
   0x8   :  { %v159_v19 = vld [vmem:[%s2613_s0 + $0xe8] sm:$0xff]  ;;  %v28_v21 = vand.u32 2139095040, %v1783_v20  ;;  %v154_v24 = vld [vmem:[%s2613_s0 + $0xc0] sm:$0xff]  ;;  %v25_v29 = vand.u32 2147483647, %v1783_v20 }
   0x9   :  { %v1522_v23 = vpack.c.bf16 %v159_v19, %v155_v18  ;;  %v158_v25 = vld [vmem:[%s2613_s0 + $0xe0] sm:$0xff] }
   0xa   :  { %1517 = vmatpush1.bf16.msra.mxu1 %v1516_v14  ;;  %v29_v26 = vshrl.u32 %v28_v21, 23  ;;  %v1524_v31 = vpack.c.bf16 %v158_v25, %v154_v24 }
   0xb   :  { %1519 = vmatprep.subr.bf16.mxu1 %v1518_v15 }
   0xc   :  { %v1419_v30 = vadd.s32 4294967169, %v29_v26 }
   0xe   :  { %1521 = vmatpush1.bf16.msra.mxu1 %v1520_v22 }
   0xf   :  { %11 = vsyncpa [#allocation4], 0  ;;  %1523 = vmatprep.subr.bf16.mxu1 %v1522_v23  ;;  %v1526_v32 = vpack.c.bf16 %v137_v28, %v133_v27  ;;  %v35_v33 = vadd.s32 1, %v1419_v30  ;;  %v32_v34 = vand.u32 8388607, %v25_v29  ;;  %vm27_vm7 = vcmp.lt.s32.totalorder %v1783_v20, 0 }
  0x10   :  { %v1690_v40 = vmov 683565275   ;;  %v1691_v42 = vmov 2475754826   ;;  %v1692_v44 = vmov 2131351028   ;;  %vm117_vm12 = vweird.f32 %v1783_v20 }
  0x11   :  { %vm36_vm0 = vcmp.gt.s32.totalorder %v35_v33, 0  ;;  %v33_v37 = vor.u32 8388608, %v32_v34  ;;  %v1693_v46 = vmov 2102212464   ;;  %v1694_v48 = vmov 920167782  }
  0x12   :  { %1525 = vmatpush1.bf16.msra.mxu1 %v1524_v31  ;;  %v37_v35 = vsel %vm36_vm0, %v35_v33, 0  ;;  %v1695_v55 = vmov 1326507024   ;;  %vm26_vm8 = vcmp.le.f32.partialorder %v25_v29, 0.7853982  ;;  %vm162_vm13 = vcmask 523264  }
  0x13   :  { %1527 = vmatprep.subr.bf16.mxu1 %v1526_v32  ;;  %v39_v36 = vand.u32 31, %v37_v35  ;;  %v38_v38 = vshrl.u32 %v37_v35, 5  ;;  %v73_v57 = vshll.u32 %v33_v37, 8  ;;  %s1697_s16 = smov 96   ;;  %s1698_s17 = smov 64  }
  0x14   :  { %s1701_s28 = smov [#allocation3]  }
  0x15   :  { %v40_v39 = vsub.s32 32, %v39_v36  ;;  %v42_v41 = vshll.u32 %v1690_v40, %v39_v36  ;;  %v45_v43 = vshll.u32 %v1691_v42, %v39_v36  ;;  %v48_v45 = vshll.u32 %v1692_v44, %v39_v36  ;;  %s1411_s29 = sshll.u32 %s1701_s28, 4  ;;  %s1412_s29 = int_to_ptr.vmem [resolvable:$true] %s1411_s29 }
  0x16   :  { %v51_v47 = vshll.u32 %v1693_v46, %v39_v36  ;;  %v54_v49 = vshll.u32 %v1694_v48, %v39_v36  ;;  %vm57_vm1 = vcmp.lt.s32.totalorder %v38_v38, 1  ;;  %vm60_vm2 = vcmp.lt.s32.totalorder %v38_v38, 4  ;;  %s1665_s30 = scalar_lea.vmem %s1412_s29, 16  ;;  %s1669_s7 = scalar_lea.vmem %s1412_s29, 32 }
  0x17   :  { %v41_v50 = vshrl.u32 %v1690_v40, %v40_v39  ;;  %v43_v51 = vshrl.u32 %v1691_v42, %v40_v39  ;;  %v46_v52 = vshrl.u32 %v1692_v44, %v40_v39  ;;  %v49_v53 = vshrl.u32 %v1693_v46, %v40_v39  ;;  %p1666_p0 = scmp.ne.s32.totalorder %s1412_s29, %s1665_s30  ;;  %p1670_p1 = scmp.lt.s32.totalorder %s1412_s29, %s1412_s29 }
  0x18   :  { %v52_v54 = vshrl.u32 %v1694_v48, %v40_v39  ;;  %v55_v56 = vshrl.u32 %v1695_v55, %v40_v39  ;;  %vm58_vm3 = vcmp.lt.s32.totalorder %v38_v38, 2  ;;  %vm59_vm4 = vcmp.lt.s32.totalorder %v38_v38, 3  ;;  %p1671_p2 = scmp.lt.s32.totalorder %s1669_s7, %s1665_s30 }
  0x19   :  { %v44_v58 = vor.u32 %v43_v51, %v42_v41  ;;  %v47_v59 = vor.u32 %v46_v52, %v45_v43  ;;  %v50_v60 = vor.u32 %v49_v53, %v48_v45 }
  0x1a   :  { %v53_v61 = vor.u32 %v52_v54, %v51_v47  ;;  %v56_v62 = vor.u32 %v55_v56, %v54_v49  ;;  %p1672_p3 = por %p1671_p2, %p1670_p1 }
  0x1b   :  { %v61_v63 = vsel %vm57_vm1, %v41_v50, %v44_v58  ;;  %v62_v0 = vsel %vm60_vm2, %v50_v60, 2102212464  ;;  %v65_v1 = vsel %vm57_vm1, %v44_v58, %v47_v59  ;;  %v69_v2 = vsel %vm57_vm1, %v47_v59, %v50_v60 }
  0x1c   :  { %v63_v3 = vsel %vm59_vm4, %v47_v59, %v62_v0  ;;  %v66_v4 = vsel %vm60_vm2, %v53_v61, 920167782  ;;  %v70_v5 = vsel %vm60_vm2, %v56_v62, 1326507024  ;;  %v136_v62 = vld [vmem:[%s2613_s0 + $0x30] sm:$0xff]  ;;  %v141_v0 = vld [vmem:[%s2613_s0 + $0x58] sm:$0xff]  ;;  %p1673_p4 = pnand %p1672_p3, %p1666_p0 }
  0x1d   :  { %v67_v6 = vsel %vm59_vm4, %v50_v60, %v66_v4  ;;  %v71_v8 = vsel %vm59_vm4, %v53_v61, %v70_v5  ;;  %v64_v9 = vsel %vm58_vm3, %v61_v63, %v63_v3  ;;  %v132_v61 = vld [vmem:[%s2613_s0 + $0x10] sm:$0xff]  ;;  %vm320_vm4 = vcmask 261120  }
  0x1e   :  { %v68_v10 = vsel %vm58_vm3, %v65_v1, %v67_v6  ;;  %v72_v11 = vsel %vm58_vm3, %v69_v2, %v71_v8  ;;  %v80_v16 = vmul.u32 %v73_v57, %v64_v9  ;;  %v145_v1 = vld [vmem:[%s2613_s0 + $0x78] sm:$0xff]  ;;  %v1528_v3 = vpack.c.bf16 %v136_v62, %v132_v61  ;;  %v140_v6 = vld [vmem:[%s2613_s0 + $0x50] sm:$0xff] }
  0x1f   :  { %v1812_v12 = vmul.u32.u64.low %v73_v57, %v72_v11  ;;  %v1813_v13 = vmul.u32.u64.high %v73_v57, %v72_v11, %v1812_v12  ;;  %v1815_v14 = vmul.u32.u64.low %v73_v57, %v68_v10  ;;  %v1816_v15 = vmul.u32.u64.high %v73_v57, %v68_v10, %v1815_v14  ;;  %v144_v8 = vld [vmem:[%s2613_s0 + $0x70] sm:$0xff]  ;;  %v149_v9 = vld [vmem:[%s2613_s0 + $0x98] sm:$0xff] }
  0x20   :  { %v1530_v5 = vpack.c.bf16 %v145_v1, %v141_v0  ;;  %v153_v10 = vld [vmem:[%s2613_s0 + $0xb8] sm:$0xff]  ;;  %v1532_v11 = vpack.c.bf16 %v144_v8, %v140_v6 }
  0x21   :  { %vm82_vm5 = vc.u32 %v1813_v13, %v1815_v14  ;;  %v83_v17 = vadd.s32 1, %v1816_v15  ;;  %v81_v30 = vadd.s32 %v1815_v14, %v1813_v13  ;;  %v1534_v12 = vpack.c.bf16 %v153_v10, %v149_v9  ;;  %v148_v13 = vld [vmem:[%s2613_s0 + $0x90] sm:$0xff] }
  0x22   :  { %v152_v14 = vld [vmem:[%s2613_s0 + $0xb0] sm:$0xff] }
  0x23   :  { %v84_v18 = vsel %vm82_vm5, %v83_v17, %v1816_v15  ;;  %v157_v15 = vld [vmem:[%s2613_s0 + $0xd8] sm:$0xff] }
  0x24   :  { %v85_v19 = vadd.s32 %v84_v18, %v80_v16  ;;  %v161_v16 = vld [vmem:[%s2613_s0 + $0xf8] sm:$0xff]  ;;  %v156_v18 = vld [vmem:[%s2613_s0 + $0xd0] sm:$0xff] }
  0x25   :  { %v1538_v17 = vpack.c.bf16 %v161_v16, %v157_v15 }
  0x26   :  { %v86_v21 = vadd.s32 536870912, %v85_v19 }
  0x28   :  { %v87_v22 = vshrl.u32 %v86_v21, 30 }
  0x2a   :  { %v88_v23 = vshll.u32 %v87_v22, 30  ;;  %v111_v45 = vsub.s32 4, %v87_v22 }
  0x2c   :  { %v89_v24 = vsub.s32 %v85_v19, %v88_v23  ;;  %v112_v50 = vsel %vm27_vm7, %v111_v45, %v87_v22  ;;  %v160_v19 = vld [vmem:[%s2613_s0 + $0xf0] sm:$0xff]  ;;  %v1875_v22 = vld [vmem:[%s2615_s2] sm:$0xff] }
  0x2d   :  { %v114_v53 = vsel %vm26_vm8, 0, %v112_v50  ;;  %v1540_v21 = vpack.c.bf16 %v160_v19, %v156_v18  ;;  %v382_v23 = vand.u32 2139095040, %v1875_v22 }
  0x2e   :  { %v91_v25 = vsub.s32 0, %v89_v24  ;;  %v118_v54 = vadd.s32 3, %v114_v53 }
  0x30   :  { %v1420_v26 = vmin.u32 %v91_v25, %v89_v24  ;;  %v119_v56 = vand.u32 3, %v118_v54 }
  0x32   :  { %v93_v27 = vclz %v1420_v26  ;;  %vm124_vm9 = vcmp.eq.s32.totalorder %v119_v56, 2  ;;  %vm121_vm10 = vcmp.eq.s32.totalorder %v119_v56, 0  ;;  %vm120_vm11 = vcmp.lt.s32.totalorder %v119_v56, 2 }
  0x34   :  { %v1421_v28 = vadd.s32 4294967294, %v93_v27 }
  0x36   :  { %vm1422_vm6 = vcmp.lt.s32.totalorder %v1421_v28, 0 }
  0x37   :  { %v96_v31 = vsel %vm1422_vm6, 0, %v1421_v28 }
  0x38   :  { %v97_v32 = vsub.s32 32, %v96_v31  ;;  %v98_v33 = vshll.u32 %v89_v24, %v96_v31  ;;  %v101_v34 = vsub.s32 4294967266, %v96_v31  ;;  %v383_v24 = vshrl.u32 %v382_v23, 23 }
  0x39   :  { %v379_v31 = vand.u32 2147483647, %v1875_v22 }
  0x3a   :  { %v99_v35 = vshrl.u32 %v81_v30, %v97_v32  ;;  %v102_v36 = vadd.s32 127, %v101_v34  ;;  %v1425_v25 = vadd.s32 4294967169, %v383_v24 }
  0x3b   :  { %v386_v34 = vand.u32 8388607, %v379_v31 }
  0x3c   :  { %v100_v37 = vor.u32 %v99_v35, %v98_v33  ;;  %v103_v38 = vshll.u32 %v102_v36, 23  ;;  %v389_v26 = vadd.s32 1, %v1425_v25 }
  0x3d   :  { %v387_v45 = vor.u32 8388608, %v386_v34 }
  0x3e   :  { %v104_v39 = vor.u32 4788187, %v103_v38  ;;  %v107_v41 = vcvt.s32.f32 %v100_v37  ;;  %vm390_vm14 = vcmp.gt.s32.totalorder %v389_v26, 0 }
  0x3f   :  { %v391_v27 = vsel %vm390_vm14, %v389_v26, 0  ;;  %v427_v54 = vshll.u32 %v387_v45, 8 }
  0x40   :  { %v105_v43 = vand.u32 2147483647, %v104_v39  ;;  %v393_v28 = vand.u32 31, %v391_v27  ;;  %v392_v35 = vshrl.u32 %v391_v27, 5 }
  0x42   :  { %v108_v47 = vmul.f32 %v107_v41, %v105_v43  ;;  %v394_v30 = vsub.s32 32, %v393_v28  ;;  %v405_v32 = vshll.u32 %v1693_v46, %v393_v28  ;;  %v396_v36 = vshll.u32 %v1690_v40, %v393_v28 }
  0x43   :  { %v399_v38 = vshll.u32 %v1691_v42, %v393_v28  ;;  %v402_v41 = vshll.u32 %v1692_v44, %v393_v28  ;;  %v408_v50 = vshll.u32 %v1694_v48, %v393_v28  ;;  %vm411_vm15 = vcmp.lt.s32.totalorder %v392_v35, 1 }
  0x44   :  { %v109_v49 = vxor.u32 2147483648, %v108_v47  ;;  %v406_v33 = vshrl.u32 %v1694_v48, %v394_v30  ;;  %v397_v37 = vshrl.u32 %v1691_v42, %v394_v30  ;;  %v400_v39 = vshrl.u32 %v1692_v44, %v394_v30 }
  0x45   :  { %v403_v43 = vshrl.u32 %v1693_v46, %v394_v30  ;;  %v409_v53 = vshrl.u32 %v1695_v55, %v394_v30  ;;  %vm412_vm0 = vcmp.lt.s32.totalorder %v392_v35, 2  ;;  %vm413_vm1 = vcmp.lt.s32.totalorder %v392_v35, 3 }
  0x46   :  { %v110_v51 = vsel %vm27_vm7, %v109_v49, %v108_v47  ;;  %v398_v47 = vor.u32 %v397_v37, %v396_v36  ;;  %v407_v49 = vor.u32 %v406_v33, %v405_v32  ;;  %vm414_vm2 = vcmp.lt.s32.totalorder %v392_v35, 4 }
  0x47   :  { %v113_v52 = vsel %vm26_vm8, %v1783_v20, %v110_v51  ;;  %v401_v51 = vor.u32 %v400_v39, %v399_v38  ;;  %v410_v56 = vor.u32 %v409_v53, %v408_v50 }
  0x48   :  { %1625 = vcosq.f32 %v113_v52 }
  0x49   :  { %1627 = vsinq.f32 %v113_v52  ;;  %v404_v52 = vor.u32 %v403_v43, %v402_v41  ;;  %v424_v62 = vsel %vm414_vm2, %v410_v56, 1326507024 }
  0x4a   :  { %v425_v0 = vsel %vm413_vm1, %v407_v49, %v424_v62 }
  0x52   :  { %v1626_v57 = vpop.eup %1625 }
  0x53   :  { %v1628_v58 = vpop.eup %1627  ;;  %v125_v59 = vxor.u32 2147483648, %v1626_v57 }
  0x54   :  { %v122_v60 = vxor.u32 2147483648, %v1628_v58 }
  0x55   :  { %v126_v29 = vsel %vm124_vm9, %v125_v59, %v1628_v58  ;;  %v420_v58 = vsel %vm414_vm2, %v407_v49, 920167782  ;;  %vm381_vm9 = vcmp.lt.s32.totalorder %v1875_v22, 0 }
  0x56   :  { %v123_v63 = vsel %vm121_vm10, %v1626_v57, %v122_v60  ;;  %v419_v57 = vsel %vm411_vm15, %v398_v47, %v401_v51  ;;  %v421_v59 = vsel %vm413_vm1, %v404_v52, %v420_v58  ;;  %v423_v60 = vsel %vm411_vm15, %v401_v51, %v404_v52 }
  0x57   :  { %v127_v2 = vsel %vm120_vm11, %v123_v63, %v126_v29  ;;  %v395_v29 = vshrl.u32 %v1690_v40, %v394_v30  ;;  %v422_v61 = vsel %vm412_vm0, %v419_v57, %v421_v59  ;;  %v416_v63 = vsel %vm414_vm2, %v404_v52, 2102212464 }
  0x58   :  { %v128_v20 = vsel %vm117_vm12, nan, %v127_v2  ;;  %v1895_v1 = vmul.u32.u64.low %v427_v54, %v422_v61  ;;  %v1896_v2 = vmul.u32.u64.high %v427_v54, %v422_v61, %v1895_v1  ;;  %vm1928_vm10 = vcmp.le.f32.partialorder %v379_v31, 0.7853982 }
  0x59   :  { %v129_v4 = vmul.f32 0.8, %v128_v20  ;;  %v415_v20 = vsel %vm411_vm15, %v395_v29, %v398_v47 }
  0x5a   :  { %v437_v10 = vadd.s32 1, %v1896_v2 }
  0x5b   :  { %1423 = vmatmul.mubr.msk.f32.vlgmr.msra.gmra.mrb[0].mxu1 %vm162_vm13, %v129_v4 }
  0x5c   :  { %1529 = vmatpush1.bf16.msra.mxu1 %v1528_v3  ;;  %301 = vmatprep.mubr.f32.mxu1 %v1689_v7  ;;  %v1536_v7 = vpack.c.bf16 %v152_v14, %v148_v13  ;;  %v417_v3 = vsel %vm413_vm1, %v401_v51, %v416_v63  ;;  %v1910_v14 = vld [vmem:[%s2615_s2 + $0x8] sm:$0xff]  ;;  %s1696_s2 = smov 32  }
  0x5d   :  { %1531 = vmatprep.subr.bf16.mxu1 %v1530_v5  ;;  %v418_v5 = vsel %vm412_vm0, %v415_v20, %v417_v3  ;;  %v483_v63 = vand.u32 2147483647, %v1910_v14 }
  0x5e   :  { %v434_v9 = vmul.u32 %v427_v54, %v418_v5 }
  0x60   :  { %1533 = vmatpush1.bf16.msra.mxu1 %v1532_v11 }
  0x61   :  { %1535 = vmatprep.subr.bf16.mxu1 %v1534_v12 }
  0x64   :  { %1537 = vmatpush1.bf16.msra.mxu1 %v1536_v7  ;;  %v486_v7 = vand.u32 2139095040, %v1910_v14 }
  0x65   :  { %1539 = vmatprep.subr.bf16.mxu1 %v1538_v17 }
  0x66   :  { %v487_v19 = vshrl.u32 %v486_v7, 23 }
  0x68   :  { %1541 = vmatpush1.bf16.msra.mxu1 %v1540_v21  ;;  %v1429_v24 = vadd.s32 4294967169, %v487_v19 }
  0x6a   :  { %v493_v27 = vadd.s32 1, %v1429_v24 }
  0x6b   :  { %1424 = vmatmul.mubr.msk.f32.vlgmr.msra.gmra.mrb[2].mxu1 %vm162_vm13, %v129_v4  ;;  %v426_v4 = vsel %vm412_vm0, %v423_v60, %v425_v0 }
  0x6c   :  { %v1901_v6 = vmul.u32.u64.low %v427_v54, %v426_v4  ;;  %v1902_v8 = vmul.u32.u64.high %v427_v54, %v426_v4, %v1901_v6  ;;  %vm494_vm8 = vcmp.gt.s32.totalorder %v493_v27, 0 }
  0x6d   :  { %v495_v51 = vsel %vm494_vm8, %v493_v27, 0 }
  0x6e   :  { %vm436_vm3 = vc.u32 %v1902_v8, %v1895_v1  ;;  %v435_v32 = vadd.s32 %v1895_v1, %v1902_v8  ;;  %v497_v53 = vand.u32 31, %v495_v51  ;;  %v1947_v4 = vshrl.u32 %v495_v51, 5 }
  0x6f   :  { %v438_v11 = vsel %vm436_vm3, %v437_v10, %v1896_v2  ;;  %v1699_v51 = vmov 0  }
  0x70   :  { %v439_v12 = vadd.s32 %v438_v11, %v434_v9  ;;  %v1932_v58 = vsub.s32 32, %v497_v53  ;;  %v512_v0 = vshll.u32 %v1694_v48, %v497_v53  ;;  %v509_v5 = vshll.u32 %v1693_v46, %v497_v53  ;;  %1623 = vset.pattern.permute.xlu1 %v1699_v51  ;;  %1624 = vset.pattern.permute.xlu0 %v1699_v51 }
  0x71   :  { %v503_v9 = vshll.u32 %v1691_v42, %v497_v53  ;;  %v500_v7 = vshll.u32 %v1690_v40, %v497_v53  ;;  %vm518_vm13 = vcmp.lt.s32.totalorder %v1947_v4, 4  ;;  %vm515_vm14 = vcmp.lt.s32.totalorder %v1947_v4, 1 }
  0x72   :  { %v440_v13 = vadd.s32 536870912, %v439_v12  ;;  %v513_v20 = vshrl.u32 %v1695_v55, %v1932_v58  ;;  %v510_v6 = vshrl.u32 %v1694_v48, %v1932_v58  ;;  %v504_v11 = vshrl.u32 %v1692_v44, %v1932_v58 }
  0x73   :  { %vm517_vm15 = vcmp.lt.s32.totalorder %v1947_v4, 3  ;;  %vm516_vm2 = vcmp.lt.s32.totalorder %v1947_v4, 2 }
  0x74   :  { %v1912_v15 = vshrl.u32 %v440_v13, 30  ;;  %v507_v13 = vshrl.u32 %v1693_v46, %v1932_v58  ;;  %v511_v19 = vor.u32 %v510_v6, %v509_v5 }
  0x76   :  { %v442_v16 = vshll.u32 %v1912_v15, 30  ;;  %v465_v2 = vsub.s32 4, %v1912_v15 }
  0x78   :  { %v443_v17 = vsub.s32 %v439_v12, %v442_v16  ;;  %v466_v8 = vsel %vm381_vm9, %v465_v2, %v1912_v15  ;;  %v506_v12 = vshll.u32 %v1692_v44, %v497_v53  ;;  %v514_v15 = vor.u32 %v513_v20, %v512_v0 }
  0x79   :  { %v468_v10 = vsel %vm1928_vm10, 0, %v466_v8 }
  0x7a   :  { %v445_v18 = vsub.s32 0, %v443_v17  ;;  %v472_v16 = vadd.s32 3, %v468_v10  ;;  %v508_v24 = vor.u32 %v507_v13, %v506_v12 }
  0x7c   :  { %v1426_v21 = vmin.u32 %v445_v18, %v443_v17  ;;  %v490_v18 = vand.u32 8388607, %v483_v63 }
  0x7e   :  { %v447_v23 = vclz %v1426_v21  ;;  %v473_v21 = vand.u32 3, %v472_v16 }
  0x80   :  { %v1427_v25 = vadd.s32 4294967294, %v447_v23  ;;  %v505_v23 = vor.u32 %v504_v11, %v503_v9  ;;  %vm478_vm0 = vcmp.eq.s32.totalorder %v473_v21, 2  ;;  %vm475_vm1 = vcmp.eq.s32.totalorder %v473_v21, 0 }
  0x81   :  { %vm474_vm3 = vcmp.lt.s32.totalorder %v473_v21, 2 }
  0x82   :  { %vm1428_vm5 = vcmp.lt.s32.totalorder %v1427_v25, 0 }
  0x83   :  { %v450_v33 = vsel %vm1428_vm5, 0, %v1427_v25  ;;  %vm471_vm5 = vweird.f32 %v1875_v22 }
  0x84   :  { %v451_v35 = vsub.s32 32, %v450_v33  ;;  %v455_v36 = vsub.s32 4294967266, %v450_v33  ;;  %v452_v38 = vshll.u32 %v443_v17, %v450_v33  ;;  %v501_v17 = vshrl.u32 %v1691_v42, %v1932_v58 }
  0x86   :  { %v453_v41 = vshrl.u32 %v435_v32, %v451_v35  ;;  %v456_v43 = vadd.s32 127, %v455_v36  ;;  %v502_v25 = vor.u32 %v501_v17, %v500_v7  ;;  %v527_v35 = vsel %vm515_vm14, %v505_v23, %v508_v24 }
  0x88   :  { %v454_v45 = vor.u32 %v453_v41, %v452_v38  ;;  %v457_v47 = vshll.u32 %v456_v43, 23  ;;  %v523_v38 = vsel %vm515_vm14, %v502_v25, %v505_v23 }
  0x8a   :  { %v458_v49 = vor.u32 4788187, %v457_v47  ;;  %v461_v50 = vcvt.s32.f32 %v454_v45 }
  0x8c   :  { %v459_v52 = vand.u32 2147483647, %v458_v49  ;;  %v1997_v49 = vld [vmem:[%s2616_s3] sm:$0xff] }
  0x8e   :  { %v462_v54 = vmul.f32 %v461_v50, %v459_v52  ;;  %v707_v52 = vand.u32 2139095040, %v1997_v49 }
  0x90   :  { %v463_v57 = vxor.u32 2147483648, %v462_v54 }
  0x92   :  { %v464_v60 = vsel %vm381_vm9, %v463_v57, %v462_v54  ;;  %v708_v57 = vshrl.u32 %v707_v52, 23 }
  0x93   :  { %v467_v62 = vsel %vm1928_vm10, %v1875_v22, %v464_v60 }
  0x94   :  { %1629 = vcosq.f32 %v467_v62 }
  0x95   :  { %1631 = vsinq.f32 %v467_v62  ;;  %v1433_v62 = vadd.s32 4294967169, %v708_v57 }
  0x97   :  { %v714_v0 = vadd.s32 1, %v1433_v62 }
  0x9e   :  { %v1630_v27 = vpop.eup %1629 }
  0x9f   :  { %v1632_v32 = vpop.eup %1631  ;;  %v479_v33 = vxor.u32 2147483648, %v1630_v27 }
 0x12e   :  { %v232_v26 = vpop.f32.mrb[0].mxu1 }
 0x12f   :  { %vm308_vm6 = vcmp.gt.f32.partialorder %v232_v26, 0.0  ;;  %v312_v28 = vmul.f32 0.2, %v232_v26  ;;  %v234_v30 = vpop.f32.mrb[1].mxu1 }
 0x130   :  { %vm309_vm7 = vcmp.gt.f32.partialorder %v234_v30, 0.0  ;;  %v313_v34 = vmul.f32 0.2, %v234_v30 }
 0x131   :  { %v316_v37 = vsel %vm308_vm6, %v232_v26, %v312_v28  ;;  %v528_v26 = vsel %vm518_vm13, %v514_v15, 1326507024  ;;  %v491_v28 = vor.u32 8388608, %v490_v18  ;;  %vm715_vm6 = vcmp.gt.s32.totalorder %v714_v0, 0 }
 0x132   :  { %331 = vrot.lane.b32.xlu1 %v316_v37, %s1696_s2  ;;  %321 = vst.msk [vmem:[#allocation2] sm:$0xff] %vm320_vm4, %v316_v37  ;;  %323 = vrot.lane.b32.xlu0 %v316_v37, %s1697_s16  ;;  %v317_v39 = vsel %vm309_vm7, %v234_v30, %v313_v34  ;;  %v524_v30 = vsel %vm518_vm13, %v511_v19, 920167782  ;;  %v476_v34 = vxor.u32 2147483648, %v1632_v32  ;;  %v529_v36 = vsel %vm517_vm15, %v511_v19, %v528_v26 }
 0x133   :  { %335 = vst.msk [vmem:[#allocation2 + $0x20] sm:$0xff] %vm320_vm4, %v317_v39  ;;  %v1990_v43 = vshll.u32 %v491_v28, 8  ;;  %v530_v47 = vsel %vm516_vm2, %v527_v35, %v529_v36 }
 0x134   :  { %v477_v41 = vsel %vm475_vm1, %v1630_v27, %v476_v34 }
 0x135   :  { %v2003_v54 = vmul.u32.u64.low %v1990_v43, %v530_v47  ;;  %v2004_v56 = vmul.u32.u64.high %v1990_v43, %v530_v47, %v2003_v54 }
 0x136   :  { %327 = vrot.lane.b32.xlu0 %v316_v37, %s1698_s17  ;;  %337 = vrot.lane.b32.xlu1 %v317_v39, %s1697_s16  ;;  %v480_v37 = vsel %vm478_vm0, %v479_v33, %v1632_v32 }
 0x137   :  { %v481_v45 = vsel %vm474_vm3, %v477_v41, %v480_v37 }
 0x138   :  { %v482_v22 = vsel %vm471_vm5, nan, %v481_v45  ;;  %vm796_vm5 = vweird.f32 %v1997_v49 }
 0x139   :  { %v587_v53 = vmul.f32 0.8, %v482_v22 }
 0x13a   :  { %341 = vrot.lane.b32.xlu0 %v317_v39, %s1698_s17  ;;  %345 = vrot.lane.b32.xlu1 %v317_v39, %s1696_s2  ;;  %v525_v39 = vsel %vm517_vm15, %v508_v24, %v524_v30 }
 0x13b   :  { %v526_v50 = vsel %vm516_vm2, %v523_v38, %v525_v39  ;;  %1507 = vmatprep.mubr.f32.mxu0 %v587_v53 }
 0x13e   :  { %v303_v59 = vpop.f32.mrb[2].mxu1 }
 0x13f   :  { %vm310_vm11 = vcmp.gt.f32.partialorder %v303_v59, 0.0  ;;  %v314_v29 = vmul.f32 0.2, %v303_v59  ;;  %v305_v61 = vpop.f32.mrb[3].mxu1 }
 0x140   :  { %vm311_vm12 = vcmp.gt.f32.partialorder %v305_v61, 0.0  ;;  %v315_v31 = vmul.f32 0.2, %v305_v61 }
 0x141   :  { %v318_v1 = vsel %vm310_vm11, %v303_v59, %v314_v29  ;;  %v2007_v59 = vmul.u32.u64.low %v1990_v43, %v526_v50  ;;  %v2008_v60 = vmul.u32.u64.high %v1990_v43, %v526_v50, %v2007_v59  ;;  %v704_v29 = vand.u32 2147483647, %v1997_v49 }
 0x142   :  { %v319_v3 = vsel %vm311_vm12, %v305_v61, %v315_v31  ;;  %355 = vrot.lane.b32.xlu1 %v318_v1, %s1698_s17  ;;  %349 = vst.msk [vmem:[#allocation2 + $0x40] sm:$0xff] %vm320_vm4, %v318_v1  ;;  %351 = vrot.lane.b32.xlu0 %v318_v1, %s1697_s16  ;;  %v499_v61 = vshrl.u32 %v1690_v40, %v1932_v58  ;;  %v520_v31 = vsel %vm518_vm13, %v508_v24, 2102212464 }
 0x143   :  { %363 = vst.msk [vmem:[#allocation2 + $0x60] sm:$0xff] %vm320_vm4, %v319_v3  ;;  %v521_v20 = vsel %vm517_vm15, %v505_v23, %v520_v31  ;;  %vm540_vm7 = vc.u32 %v2004_v56, %v2007_v59  ;;  %v541_v6 = vadd.s32 1, %v2008_v60  ;;  %vm706_vm15 = vcmp.lt.s32.totalorder %v1997_v49, 0 }
 0x144   :  { %v519_v2 = vsel %vm515_vm14, %v499_v61, %v502_v25  ;;  %vm705_vm0 = vcmp.le.f32.partialorder %v704_v29, 0.7853982 }
 0x145   :  { %v522_v58 = vsel %vm516_vm2, %v519_v2, %v521_v20  ;;  %v542_v19 = vsel %vm540_vm7, %v541_v6, %v2008_v60  ;;  %vm2067_vm7 = vcmp.le.f32.partialorder %v483_v63, 0.7853982 }
 0x146   :  { %359 = vrot.lane.b32.xlu0 %v318_v1, %s1696_s2  ;;  %365 = vrot.lane.b32.xlu1 %v319_v3, %s1697_s16  ;;  %v711_v1 = vand.u32 8388607, %v704_v29  ;;  %v538_v4 = vmul.u32 %v1990_v43, %v522_v58 }
 0x148   :  { %v712_v8 = vor.u32 8388608, %v711_v1  ;;  %v543_v39 = vadd.s32 %v542_v19, %v538_v4 }
 0x14a   :  { %369 = vrot.lane.b32.xlu0 %v319_v3, %s1698_s17  ;;  %373 = vrot.lane.b32.xlu1 %v319_v3, %s1696_s2  ;;  %v716_v3 = vsel %vm715_vm6, %v714_v0, 0  ;;  %v752_v27 = vshll.u32 %v712_v8, 8  ;;  %v544_v57 = vadd.s32 536870912, %v543_v39  ;;  %vm485_vm6 = vcmp.lt.s32.totalorder %v1910_v14, 0 }
 0x14b   :  { %v718_v5 = vand.u32 31, %v716_v3  ;;  %v717_v9 = vshrl.u32 %v716_v3, 5 }
 0x14c   :  { %v2048_v62 = vshrl.u32 %v544_v57, 30 }
 0x14d   :  { %v719_v10 = vsub.s32 32, %v718_v5  ;;  %v721_v11 = vshll.u32 %v1690_v40, %v718_v5  ;;  %v724_v12 = vshll.u32 %v1691_v42, %v718_v5  ;;  %v727_v13 = vshll.u32 %v1692_v44, %v718_v5 }
 0x14e   :  { %v730_v16 = vshll.u32 %v1693_v46, %v718_v5  ;;  %v733_v7 = vshll.u32 %v1694_v48, %v718_v5  ;;  %vm736_vm8 = vcmp.lt.s32.totalorder %v717_v9, 1  ;;  %vm738_vm9 = vcmp.lt.s32.totalorder %v717_v9, 3 }
 0x14f   :  { %v720_v17 = vshrl.u32 %v1690_v40, %v719_v10  ;;  %v722_v15 = vshrl.u32 %v1691_v42, %v719_v10  ;;  %v725_v18 = vshrl.u32 %v1692_v44, %v719_v10  ;;  %v728_v21 = vshrl.u32 %v1693_v46, %v719_v10 }
 0x150   :  { %v731_v23 = vshrl.u32 %v1694_v48, %v719_v10  ;;  %v734_v24 = vshrl.u32 %v1695_v55, %v719_v10  ;;  %vm737_vm10 = vcmp.lt.s32.totalorder %v717_v9, 2  ;;  %vm739_vm11 = vcmp.lt.s32.totalorder %v717_v9, 4 }
 0x151   :  { %v723_v25 = vor.u32 %v722_v15, %v721_v11  ;;  %v726_v26 = vor.u32 %v725_v18, %v724_v12  ;;  %v729_v28 = vor.u32 %v728_v21, %v727_v13  ;;  %v546_v2 = vshll.u32 %v2048_v62, 30 }
 0x152   :  { %v732_v30 = vor.u32 %v731_v23, %v730_v16  ;;  %v735_v32 = vor.u32 %v734_v24, %v733_v7 }
 0x153   :  { %v740_v33 = vsel %vm736_vm8, %v720_v17, %v723_v25  ;;  %v744_v34 = vsel %vm736_vm8, %v723_v25, %v726_v26  ;;  %v741_v35 = vsel %vm739_vm11, %v729_v28, 2102212464  ;;  %v748_v37 = vsel %vm736_vm8, %v726_v26, %v729_v28 }
 0x154   :  { %v745_v36 = vsel %vm739_vm11, %v732_v30, 920167782  ;;  %v749_v38 = vsel %vm739_vm11, %v735_v32, 1326507024  ;;  %v742_v41 = vsel %vm738_vm9, %v726_v26, %v741_v35  ;;  %v547_v5 = vsub.s32 %v543_v39, %v546_v2 }
 0x155   :  { %v746_v43 = vsel %vm738_vm9, %v729_v28, %v745_v36  ;;  %v750_v45 = vsel %vm738_vm9, %v732_v30, %v749_v38  ;;  %v743_v47 = vsel %vm737_vm10, %v740_v33, %v742_v41  ;;  %v539_v39 = vadd.s32 %v2007_v59, %v2004_v56 }
 0x156   :  { %v747_v22 = vsel %vm737_vm10, %v744_v34, %v746_v43  ;;  %v751_v50 = vsel %vm737_vm10, %v748_v37, %v750_v45  ;;  %v759_v60 = vmul.u32 %v752_v27, %v743_v47  ;;  %v549_v8 = vsub.s32 0, %v547_v5 }
 0x157   :  { %v2040_v51 = vmul.u32.u64.low %v752_v27, %v751_v50  ;;  %v2041_v52 = vmul.u32.u64.high %v752_v27, %v751_v50, %v2040_v51  ;;  %v2043_v53 = vmul.u32.u64.low %v752_v27, %v747_v22  ;;  %v2044_v54 = vmul.u32.u64.high %v752_v27, %v747_v22, %v2043_v53 }
 0x158   :  { %v1430_v11 = vmin.u32 %v549_v8, %v547_v5  ;;  %vm575_vm11 = vweird.f32 %v1910_v14 }
 0x159   :  { %vm761_vm12 = vc.u32 %v2041_v52, %v2043_v53  ;;  %v762_v61 = vadd.s32 1, %v2044_v54  ;;  %v760_v13 = vadd.s32 %v2043_v53, %v2041_v52 }
 0x15a   :  { %v551_v16 = vclz %v1430_v11 }
 0x15b   :  { %v763_v31 = vsel %vm761_vm12, %v762_v61, %v2044_v54 }
 0x15c   :  { %v764_v0 = vadd.s32 %v763_v31, %v759_v60  ;;  %v1431_v21 = vadd.s32 4294967294, %v551_v16 }
 0x15e   :  { %v765_v1 = vadd.s32 536870912, %v764_v0  ;;  %vm1432_vm14 = vcmp.lt.s32.totalorder %v1431_v21, 0 }
 0x15f   :  { %v554_v30 = vsel %vm1432_vm14, 0, %v1431_v21  ;;  %v593_v21 = vld [vmem:[#allocation2 + $0x20] sm:$0xff] }
 0x160   :  { %v766_v20 = vshrl.u32 %v765_v1, 30  ;;  %v559_v35 = vsub.s32 4294967266, %v554_v30  ;;  %v555_v41 = vsub.s32 32, %v554_v30  ;;  %v556_v47 = vshll.u32 %v547_v5, %v554_v30 }
 0x162   :  { %v767_v3 = vshll.u32 %v766_v20, 30  ;;  %v790_v28 = vsub.s32 4, %v766_v20  ;;  %v560_v43 = vadd.s32 127, %v559_v35  ;;  %v557_v22 = vshrl.u32 %v539_v39, %v555_v41  ;;  %v597_v39 = vld [vmem:[#allocation2 + $0x40] sm:$0xff] }
 0x164   :  { %v768_v58 = vsub.s32 %v764_v0, %v767_v3  ;;  %v791_v34 = vsel %vm706_vm15, %v790_v28, %v766_v20  ;;  %v561_v50 = vshll.u32 %v560_v43, 23  ;;  %v558_v29 = vor.u32 %v557_v22, %v556_v47 }
 0x165   :  { %v793_v38 = vsel %vm705_vm0, 0, %v791_v34 }
 0x166   :  { %v770_v6 = vsub.s32 0, %v768_v58  ;;  %v797_v45 = vadd.s32 3, %v793_v38  ;;  %v562_v52 = vor.u32 4788187, %v561_v50  ;;  %v565_v31 = vcvt.s32.f32 %v558_v29 }
 0x168   :  { %v1434_v9 = vmin.u32 %v770_v6, %v768_v58  ;;  %v798_v51 = vand.u32 3, %v797_v45  ;;  %v563_v61 = vand.u32 2147483647, %v562_v52  ;;  %v601_v52 = vld [vmem:[#allocation2 + $0x60] sm:$0xff] }
 0x16a   :  { %v772_v10 = vclz %v1434_v9  ;;  %vm803_vm1 = vcmp.eq.s32.totalorder %v798_v51, 2  ;;  %vm800_vm2 = vcmp.eq.s32.totalorder %v798_v51, 0  ;;  %vm799_vm3 = vcmp.lt.s32.totalorder %v798_v51, 2 }
 0x16b   :  { %v566_v2 = vmul.f32 %v565_v31, %v563_v61 }
 0x16c   :  { %v1435_v12 = vadd.s32 4294967294, %v772_v10 }
 0x16e   :  { %vm1436_vm13 = vcmp.lt.s32.totalorder %v1435_v12, 0 }
 0x16f   :  { %v775_v7 = vsel %vm1436_vm13, 0, %v1435_v12  ;;  %v589_v12 = vld [vmem:[#allocation2] sm:$0xff] }
 0x170   :  { %v776_v4 = vsub.s32 32, %v775_v7  ;;  %v777_v17 = vshll.u32 %v768_v58, %v775_v7  ;;  %v780_v15 = vsub.s32 4294967266, %v775_v7  ;;  %v567_v58 = vxor.u32 2147483648, %v566_v2 }
 0x171   :  { %v569_v7 = vsub.s32 4, %v2048_v62 }
 0x172   :  { %v778_v18 = vshrl.u32 %v760_v13, %v776_v4  ;;  %v781_v19 = vadd.s32 127, %v780_v15  ;;  %v568_v9 = vsel %vm485_vm6, %v567_v58, %v566_v2 }
 0x173   :  { %v571_v63 = vsel %vm2067_vm7, %v1910_v14, %v568_v9  ;;  %v2100_v14 = vld [vmem:[%s2617_s4 + $0x8] sm:$0xff] }
 0x174   :  { %v779_v23 = vor.u32 %v778_v18, %v777_v17  ;;  %v782_v24 = vshll.u32 %v781_v19, 23  ;;  %v570_v19 = vsel %vm485_vm6, %v569_v7, %v2048_v62 }
 0x175   :  { %v572_v28 = vsel %vm2067_vm7, 0, %v570_v19 }
 0x176   :  { %v783_v25 = vor.u32 4788187, %v782_v24  ;;  %v786_v26 = vcvt.s32.f32 %v779_v23 }
 0x178   :  { %v784_v27 = vand.u32 2147483647, %v783_v25 }
 0x17a   :  { %v787_v32 = vmul.f32 %v786_v26, %v784_v27 }
 0x17c   :  { %v788_v33 = vxor.u32 2147483648, %v787_v32 }
 0x17e   :  { %v789_v36 = vsel %vm706_vm15, %v788_v33, %v787_v32  ;;  %v576_v32 = vadd.s32 3, %v572_v28 }
 0x17f   :  { %v792_v37 = vsel %vm705_vm0, %v1997_v49, %v789_v36  ;;  %v2106_v49 = vld [vmem:[%s2616_s3 + $0x8] sm:$0xff] }
 0x180   :  { %1633 = vcosq.f32 %v792_v37  ;;  %v577_v36 = vand.u32 3, %v576_v32 }
 0x181   :  { %1635 = vsinq.f32 %v792_v37 }
 0x182   :  { %1637 = vcosq.f32 %v571_v63  ;;  %vm579_vm8 = vcmp.eq.s32.totalorder %v577_v36, 0  ;;  %vm582_vm9 = vcmp.eq.s32.totalorder %v577_v36, 2  ;;  %vm578_vm10 = vcmp.lt.s32.totalorder %v577_v36, 2 }
 0x183   :  { %1639 = vsinq.f32 %v571_v63 }
 0x18a   :  { %v1634_v53 = vpop.eup %1633 }
 0x18b   :  { %v1636_v54 = vpop.eup %1635  ;;  %v804_v57 = vxor.u32 2147483648, %v1634_v53 }
 0x18c   :  { %v801_v60 = vxor.u32 2147483648, %v1636_v54  ;;  %v1638_v34 = vpop.eup %1637 }
 0x18d   :  { %v805_v56 = vsel %vm803_vm1, %v804_v57, %v1636_v54  ;;  %v1640_v35 = vpop.eup %1639  ;;  %v583_v47 = vxor.u32 2147483648, %v1638_v34 }
 0x18e   :  { %v802_v59 = vsel %vm800_vm2, %v1634_v53, %v801_v60  ;;  %v580_v45 = vxor.u32 2147483648, %v1640_v35 }
 0x18f   :  { %v806_v0 = vsel %vm799_vm3, %v802_v59, %v805_v56  ;;  %v584_v54 = vsel %vm582_vm9, %v583_v47, %v1640_v35 }
 0x190   :  { %v807_v1 = vsel %vm796_vm5, nan, %v806_v0  ;;  %v581_v53 = vsel %vm579_vm8, %v1638_v34, %v580_v45 }
 0x191   :  { %v912_v20 = vmul.f32 0.8, %v807_v1  ;;  %v585_v31 = vsel %vm578_vm10, %v581_v53, %v584_v54  ;;  %v2094_v1 = vld [vmem:[%s2617_s4] sm:$0xff] }
 0x192   :  { %v586_v59 = vsel %vm575_vm11, nan, %v585_v31  ;;  %v919_v2 = vand.u32 2139095040, %v2094_v1  ;;  %v916_v63 = vand.u32 2147483647, %v2094_v1  ;;  %v1020_v31 = vand.u32 2147483647, %v2100_v14 }
 0x193   :  { %1136 = vperm.xlu1 %1623, %v912_v20   ;;  %v588_v0 = vmul.f32 0.8, %v586_v59 }
 0x194   :  { %v920_v20 = vshrl.u32 %v919_v2, 23  ;;  %v923_v19 = vand.u32 8388607, %v916_v63 }
 0x196   :  { %v924_v35 = vor.u32 8388608, %v923_v19 }
 0x1a4   :  { %v332_v3 = vpop.permute.xlu1 %331  ;;  %v324_v5 = vpop.permute.xlu0 %323 }
 0x1a5   :  { %334 = vst.msk [vmem:[#allocation2 + $0x18] sm:$0xff] %vm320_vm4, %v332_v3  ;;  %326 = vst.msk [vmem:[#allocation2 + $0x8] sm:$0xff] %vm320_vm4, %v324_v5  ;;  %v1023_v3 = vand.u32 2139095040, %v2100_v14  ;;  %v1441_v5 = vadd.s32 4294967169, %v920_v20 }
 0x1a7   :  { %v1024_v58 = vshrl.u32 %v1023_v3, 23 }
 0x1a8   :  { %v328_v6 = vpop.permute.xlu0 %327  ;;  %v338_v8 = vpop.permute.xlu1 %337 }
 0x1a9   :  { %330 = vst.msk [vmem:[#allocation2 + $0x10] sm:$0xff] %vm320_vm4, %v328_v6  ;;  %340 = vst.msk [vmem:[#allocation2 + $0x28] sm:$0xff] %vm320_vm4, %v338_v8  ;;  %v926_v6 = vadd.s32 1, %v1441_v5  ;;  %v1445_v8 = vadd.s32 4294967169, %v1024_v58 }
 0x1ab   :  { %vm927_vm12 = vcmp.gt.s32.totalorder %v926_v6, 0 }
 0x1ac   :  { %v342_v10 = vpop.permute.xlu0 %341  ;;  %v346_v11 = vpop.permute.xlu1 %345  ;;  %v590_v13 = vld [vmem:[#allocation2 + $0x8] sm:$0xff]  ;;  %v592_v17 = vld [vmem:[#allocation2 + $0x18] sm:$0xff]  ;;  %v928_v9 = vsel %vm927_vm12, %v926_v6, 0 }
 0x1ad   :  { %344 = vst.msk [vmem:[#allocation2 + $0x30] sm:$0xff] %vm320_vm4, %v342_v10  ;;  %348 = vst.msk [vmem:[#allocation2 + $0x38] sm:$0xff] %vm320_vm4, %v346_v11  ;;  %v1542_v16 = vpack.c.bf16 %v590_v13, %v589_v12  ;;  %v1030_v10 = vadd.s32 1, %v1445_v8  ;;  %v811_v11 = vand.u32 2139095040, %v2106_v49  ;;  %v930_v12 = vand.u32 31, %v928_v9 }
 0x1af   :  { %1543 = vmatprep.subr.bf16.mxu0 %v1542_v16  ;;  %vm1031_vm13 = vcmp.gt.s32.totalorder %v1030_v10, 0  ;;  %v812_v13 = vshrl.u32 %v811_v11, 23 }
 0x1b0   :  { %1545 = vmatpush3.bf16.msra.mxu0 %v1542_v16  ;;  %v591_v4 = vld [vmem:[#allocation2 + $0x10] sm:$0xff]  ;;  %v594_v15 = vld [vmem:[#allocation2 + $0x28] sm:$0xff]  ;;  %v2109_v16 = vsub.s32 32, %v930_v12  ;;  %v1032_v7 = vsel %vm1031_vm13, %v1030_v10, 0  ;;  %v1027_v10 = vand.u32 8388607, %v1020_v31 }
 0x1b1   :  { %v1546_v18 = vpack.c.bf16 %v592_v17, %v591_v4  ;;  %v1550_v23 = vpack.c.bf16 %v594_v15, %v593_v21  ;;  %v1034_v4 = vand.u32 31, %v1032_v7  ;;  %v1437_v17 = vadd.s32 4294967169, %v812_v13 }
 0x1b2   :  { %v942_v15 = vshll.u32 %v1693_v46, %v930_v12  ;;  %v2117_v21 = vshrl.u32 %v928_v9, 5  ;;  %v940_v28 = vshrl.u32 %v1693_v46, %v2109_v16  ;;  %v946_v32 = vshrl.u32 %v1695_v55, %v2109_v16 }
 0x1b3   :  { %1547 = vmatprep.subr.bf16.mxu0 %v1546_v18  ;;  %v2147_v47 = vshrl.u32 %v1032_v7, 5  ;;  %v1043_v54 = vshll.u32 %v1692_v44, %v1034_v4 }
 0x1b4   :  { %v356_v24 = vpop.permute.xlu1 %355  ;;  %v352_v25 = vpop.permute.xlu0 %351  ;;  %1549 = vmatpush3.bf16.msra.mxu0 %v1546_v18  ;;  %v595_v26 = vld [vmem:[#allocation2 + $0x30] sm:$0xff]  ;;  %v596_v27 = vld [vmem:[#allocation2 + $0x38] sm:$0xff]  ;;  %v943_v18 = vshrl.u32 %v1694_v48, %v2109_v16  ;;  %vm951_vm14 = vcmp.lt.s32.totalorder %v2117_v21, 4  ;;  %vm948_vm15 = vcmp.lt.s32.totalorder %v2117_v21, 1  ;;  %vm950_vm1 = vcmp.lt.s32.totalorder %v2117_v21, 3 }
 0x1b5   :  { %358 = vst.msk [vmem:[#allocation2 + $0x50] sm:$0xff] %vm320_vm4, %v356_v24  ;;  %354 = vst.msk [vmem:[#allocation2 + $0x48] sm:$0xff] %vm320_vm4, %v352_v25  ;;  %1551 = vmatprep.subr.bf16.mxu0 %v1550_v23  ;;  %v1554_v30 = vpack.c.bf16 %v596_v27, %v595_v26  ;;  %v934_v24 = vshrl.u32 %v1691_v42, %v2109_v16  ;;  %v936_v25 = vshll.u32 %v1691_v42, %v930_v12 }
 0x1b6   :  { %v937_v26 = vshrl.u32 %v1692_v44, %v2109_v16  ;;  %v939_v27 = vshll.u32 %v1692_v44, %v930_v12  ;;  %v944_v34 = vor.u32 %v943_v18, %v942_v15  ;;  %vm949_vm2 = vcmp.lt.s32.totalorder %v2117_v21, 2 }
 0x1b7   :  { %vm1055_vm3 = vcmp.lt.s32.totalorder %v2147_v47, 4  ;;  %vm1052_vm5 = vcmp.lt.s32.totalorder %v2147_v47, 1  ;;  %vm1054_vm6 = vcmp.lt.s32.totalorder %v2147_v47, 3  ;;  %vm1053_vm7 = vcmp.lt.s32.totalorder %v2147_v47, 2 }
 0x1b8   :  { %v360_v62 = vpop.permute.xlu0 %359  ;;  %v366_v33 = vpop.permute.xlu1 %365  ;;  %1553 = vmatpush3.bf16.msra.mxu0 %v1550_v23  ;;  %v933_v23 = vshll.u32 %v1690_v40, %v930_v12  ;;  %v957_v45 = vsel %vm951_vm14, %v944_v34, 920167782 }
 0x1b9   :  { %362 = vst.msk [vmem:[#allocation2 + $0x58] sm:$0xff] %vm320_vm4, %v360_v62  ;;  %368 = vst.msk [vmem:[#allocation2 + $0x68] sm:$0xff] %vm320_vm4, %v366_v33  ;;  %1555 = vmatprep.subr.bf16.mxu0 %v1554_v30  ;;  %v2131_v62 = vsub.s32 32, %v1034_v4  ;;  %v818_v33 = vadd.s32 1, %v1437_v17 }
 0x1ba   :  { %v2134_v36 = vor.u32 %v934_v24, %v933_v23  ;;  %v1028_v23 = vor.u32 8388608, %v1027_v10 }
 0x1bb   :  { %vm819_vm0 = vcmp.gt.s32.totalorder %v818_v33, 0  ;;  %v1041_v53 = vshrl.u32 %v1692_v44, %v2131_v62 }
 0x1bc   :  { %v370_v37 = vpop.permute.xlu0 %369  ;;  %v374_v38 = vpop.permute.xlu1 %373  ;;  %1557 = vmatpush3.bf16.msra.mxu0 %v1554_v30  ;;  %v598_v41 = vld [vmem:[#allocation2 + $0x48] sm:$0xff]  ;;  %v599_v22 = vld [vmem:[#allocation2 + $0x50] sm:$0xff]  ;;  %v945_v30 = vshll.u32 %v1694_v48, %v930_v12 }
 0x1bd   :  { %372 = vst.msk [vmem:[#allocation2 + $0x70] sm:$0xff] %vm320_vm4, %v370_v37  ;;  %376 = vst.msk [vmem:[#allocation2 + $0x78] sm:$0xff] %vm320_vm4, %v374_v38  ;;  %v1558_v43 = vpack.c.bf16 %v598_v41, %v597_v39  ;;  %v2136_v37 = vor.u32 %v937_v26, %v936_v25  ;;  %v2138_v38 = vor.u32 %v940_v28, %v939_v27 }
 0x1be   :  { %v947_v39 = vor.u32 %v946_v32, %v945_v30  ;;  %v1046_v41 = vshll.u32 %v1693_v46, %v1034_v4  ;;  %v932_v28 = vshrl.u32 %v1690_v40, %v2109_v16 }
 0x1bf   :  { %1559 = vmatprep.subr.bf16.mxu0 %v1558_v43  ;;  %v956_v59 = vsel %vm948_vm15, %v2134_v36, %v2136_v37  ;;  %v958_v2 = vsel %vm950_vm1, %v2138_v38, %v957_v45  ;;  %v960_v20 = vsel %vm948_vm15, %v2136_v37, %v2138_v38 }
 0x1c0   :  { %1561 = vmatpush3.bf16.msra.mxu0 %v1558_v43  ;;  %v600_v50 = vld [vmem:[#allocation2 + $0x58] sm:$0xff]  ;;  %v602_v51 = vld [vmem:[#allocation2 + $0x68] sm:$0xff]  ;;  %v1047_v43 = vshrl.u32 %v1694_v48, %v2131_v62  ;;  %v959_v12 = vsel %vm949_vm2, %v956_v59, %v958_v2 }
 0x1c1   :  { %v1562_v29 = vpack.c.bf16 %v600_v50, %v599_v22  ;;  %v1566_v57 = vpack.c.bf16 %v602_v51, %v601_v52  ;;  %v1037_v22 = vshll.u32 %v1690_v40, %v1034_v4  ;;  %v1038_v50 = vshrl.u32 %v1691_v42, %v2131_v62 }
 0x1c2   :  { %v1040_v51 = vshll.u32 %v1691_v42, %v1034_v4  ;;  %v1050_v52 = vshrl.u32 %v1695_v55, %v2131_v62 }
 0x1c3   :  { %1563 = vmatprep.subr.bf16.mxu0 %v1562_v29  ;;  %v2181_v6 = vor.u32 %v1038_v50, %v1037_v22 }
 0x1c4   :  { %1565 = vmatpush3.bf16.msra.mxu0 %v1562_v29  ;;  %v603_v60 = vld [vmem:[#allocation2 + $0x70] sm:$0xff]  ;;  %v604_v61 = vld [vmem:[#allocation2 + $0x78] sm:$0xff]  ;;  %v1049_v29 = vshll.u32 %v1694_v48, %v1034_v4  ;;  %v2183_v8 = vor.u32 %v1041_v53, %v1040_v51  ;;  %v953_v53 = vsel %vm951_vm14, %v2138_v38, 2102212464 }
 0x1c5   :  { %1567 = vmatprep.subr.bf16.mxu0 %v1566_v57  ;;  %v1570_v56 = vpack.c.bf16 %v604_v61, %v603_v60  ;;  %v820_v60 = vsel %vm819_vm0, %v818_v33, 0  ;;  %v961_v61 = vsel %vm951_vm14, %v947_v39, 1326507024  ;;  %v954_v38 = vsel %vm950_vm1, %v2136_v37, %v953_v53 }
 0x1c6   :  { %v1051_v3 = vor.u32 %v1050_v52, %v1049_v29  ;;  %v822_v5 = vand.u32 31, %v820_v60  ;;  %v962_v58 = vsel %vm950_vm1, %v944_v34, %v961_v61  ;;  %v1060_v17 = vsel %vm1052_vm5, %v2181_v6, %v2183_v8 }
 0x1c7   :  { %v963_v13 = vsel %vm949_vm2, %v960_v20, %v962_v58  ;;  %v808_v34 = vand.u32 2147483647, %v2106_v49  ;;  %v1036_v58 = vshrl.u32 %v1690_v40, %v2131_v62 }
 0x1c8   :  { %1569 = vmatpush3.bf16.msra.mxu0 %v1566_v57  ;;  %v1044_v57 = vshrl.u32 %v1693_v46, %v2131_v62  ;;  %v1065_v7 = vsel %vm1055_vm3, %v1051_v3, 1326507024  ;;  %v2197_v4 = vsub.s32 32, %v822_v5  ;;  %v834_v32 = vshll.u32 %v1693_v46, %v822_v5 }
 0x1c9   :  { %1571 = vmatprep.subr.bf16.mxu0 %v1570_v56  ;;  %v837_v39 = vshll.u32 %v1694_v48, %v822_v5  ;;  %v825_v45 = vshll.u32 %v1690_v40, %v822_v5  ;;  %v828_v22 = vshll.u32 %v1691_v42, %v822_v5  ;;  %v831_v29 = vshll.u32 %v1692_v44, %v822_v5 }
 0x1ca   :  { %v1045_v9 = vor.u32 %v1044_v57, %v1043_v54  ;;  %v835_v33 = vshrl.u32 %v1694_v48, %v2197_v4  ;;  %v826_v50 = vshrl.u32 %v1691_v42, %v2197_v4  ;;  %v829_v51 = vshrl.u32 %v1692_v44, %v2197_v4 }
 0x1cb   :  { %v832_v52 = vshrl.u32 %v1693_v46, %v2197_v4  ;;  %v952_v57 = vsel %vm948_vm15, %v932_v28, %v2134_v36 }
 0x1cc   :  { %1573 = vmatpush3.bf16.msra.mxu0 %v1570_v56  ;;  %v1048_v56 = vor.u32 %v1047_v43, %v1046_v41  ;;  %v1064_v26 = vsel %vm1052_vm5, %v2183_v8, %v1045_v9  ;;  %v838_v41 = vshrl.u32 %v1695_v55, %v2197_v4  ;;  %v1068_v43 = vshll.u32 %v1028_v23, 8 }
 0x1cd   :  { %v836_v54 = vor.u32 %v835_v33, %v834_v32  ;;  %v827_v3 = vor.u32 %v826_v50, %v825_v45  ;;  %v830_v5 = vor.u32 %v829_v51, %v828_v22  ;;  %v833_v36 = vor.u32 %v832_v52, %v831_v29 }
 0x1ce   :  { %v1061_v11 = vsel %vm1055_vm3, %v1048_v56, 920167782  ;;  %v1066_v27 = vsel %vm1054_vm6, %v1048_v56, %v1065_v7  ;;  %v839_v61 = vor.u32 %v838_v41, %v837_v39  ;;  %v824_v39 = vshrl.u32 %v1690_v40, %v2197_v4 }
 0x1cf   :  { %1508 = vmatmul.mubr.f32.vlgmr.msra.gmra.mrb[0].mxu0 %v588_v0  ;;  %v2169_v0 = vshll.u32 %v924_v35, 8  ;;  %v1062_v15 = vsel %vm1054_vm6, %v1045_v9, %v1061_v11  ;;  %v2228_v35 = vshrl.u32 %v820_v60, 5  ;;  %v1067_v16 = vsel %vm1053_vm7, %v1064_v26, %v1066_v27 }
 0x1d0   :  { %v1063_v30 = vsel %vm1053_vm7, %v1060_v17, %v1062_v15  ;;  %v815_v60 = vand.u32 8388607, %v808_v34  ;;  %v2253_v56 = vmul.u32.u64.low %v1068_v43, %v1067_v16  ;;  %v2254_v59 = vmul.u32.u64.high %v1068_v43, %v1067_v16, %v2253_v56 }
 0x1d1   :  { %v2207_v18 = vmul.u32.u64.low %v2169_v0, %v959_v12  ;;  %v2208_v19 = vmul.u32.u64.high %v2169_v0, %v959_v12, %v2207_v18  ;;  %v2212_v24 = vmul.u32.u64.low %v2169_v0, %v963_v13  ;;  %v2213_v25 = vmul.u32.u64.high %v2169_v0, %v963_v13, %v2212_v24 }
 0x1d2   :  { %vm843_vm8 = vcmp.lt.s32.totalorder %v2228_v35, 4  ;;  %v2256_v2 = vmul.u32.u64.low %v1068_v43, %v1063_v30  ;;  %v2257_v20 = vmul.u32.u64.high %v1068_v43, %v1063_v30, %v2256_v2  ;;  %vm840_vm9 = vcmp.lt.s32.totalorder %v2228_v35, 1 }
 0x1d3   :  { %vm842_vm10 = vcmp.lt.s32.totalorder %v2228_v35, 3  ;;  %v849_v10 = vsel %vm843_vm8, %v836_v54, 920167782  ;;  %v1057_v11 = vsel %vm1055_vm3, %v1045_v9, 2102212464  ;;  %v816_v12 = vor.u32 8388608, %v815_v60 }
 0x1d4   :  { %v853_v37 = vsel %vm843_vm8, %v839_v61, 1326507024  ;;  %v955_v13 = vsel %vm949_vm2, %v952_v57, %v954_v38  ;;  %v974_v7 = vadd.s32 1, %v2208_v19  ;;  %vm973_vm11 = vc.u32 %v2213_v25, %v2207_v18 }
 0x1d5   :  { %vm841_vm12 = vcmp.lt.s32.totalorder %v2228_v35, 2  ;;  %v848_v62 = vsel %vm840_vm9, %v827_v3, %v830_v5  ;;  %v850_v9 = vsel %vm842_vm10, %v833_v36, %v849_v10  ;;  %v1056_v17 = vsel %vm1052_vm5, %v1036_v58, %v2181_v6 }
 0x1d6   :  { %v1058_v21 = vsel %vm1054_vm6, %v2183_v8, %v1057_v11  ;;  %v852_v15 = vsel %vm840_vm9, %v830_v5, %v833_v36  ;;  %v854_v23 = vsel %vm842_vm10, %v836_v54, %v853_v37  ;;  %v971_v24 = vmul.u32 %v2169_v0, %v955_v13 }
 0x1d7   :  { %v856_v26 = vshll.u32 %v816_v12, 8  ;;  %v975_v27 = vsel %vm973_vm11, %v974_v7, %v2208_v19  ;;  %v851_v28 = vsel %vm841_vm12, %v848_v62, %v850_v9  ;;  %v1059_v6 = vsel %vm1053_vm7, %v1056_v17, %v1058_v21 }
 0x1d8   :  { %v1078_v30 = vadd.s32 1, %v2257_v20  ;;  %v855_v8 = vsel %vm841_vm12, %v852_v15, %v854_v23  ;;  %vm1077_vm13 = vc.u32 %v2254_v59, %v2256_v2  ;;  %v976_v32 = vadd.s32 %v975_v27, %v971_v24 }
 0x1d9   :  { %v2304_v33 = vmul.u32.u64.low %v856_v26, %v851_v28  ;;  %v2305_v0 = vmul.u32.u64.high %v856_v26, %v851_v28, %v2304_v33  ;;  %v1075_v19 = vmul.u32 %v1068_v43, %v1059_v6  ;;  %v845_v45 = vsel %vm843_vm8, %v833_v36, 2102212464 }
 0x1da   :  { %v2310_v41 = vmul.u32.u64.low %v856_v26, %v855_v8  ;;  %v2311_v47 = vmul.u32.u64.high %v856_v26, %v855_v8, %v2310_v41  ;;  %v1079_v16 = vsel %vm1077_vm13, %v1078_v30, %v2257_v20  ;;  %v977_v22 = vadd.s32 536870912, %v976_v32 }
 0x1db   :  { %v1080_v50 = vadd.s32 %v1079_v16, %v1075_v19  ;;  %v844_v51 = vsel %vm840_vm9, %v824_v39, %v827_v3  ;;  %v846_v29 = vsel %vm842_vm10, %v830_v5, %v845_v45  ;;  %v866_v52 = vadd.s32 1, %v2305_v0 }
 0x1dc   :  { %v2320_v43 = vshrl.u32 %v977_v22, 30  ;;  %v847_v4 = vsel %vm841_vm12, %v844_v51, %v846_v29  ;;  %vm865_vm14 = vc.u32 %v2311_v47, %v2304_v33  ;;  %v972_v27 = vadd.s32 %v2207_v18, %v2213_v25 }
 0x1dd   :  { %v1081_v53 = vadd.s32 536870912, %v1080_v50  ;;  %v863_v54 = vmul.u32 %v856_v26, %v847_v4  ;;  %v867_v60 = vsel %vm865_vm14, %v866_v52, %v2305_v0  ;;  %v1076_v39 = vadd.s32 %v2256_v2, %v2254_v59 }
 0x1de   :  { %v979_v57 = vshll.u32 %v2320_v43, 30  ;;  %vm918_vm2 = vcmp.lt.s32.totalorder %v2094_v1, 0  ;;  %vm2344_vm3 = vcmp.le.f32.partialorder %v916_v63, 0.7853982  ;;  %vm1022_vm5 = vcmp.lt.s32.totalorder %v2100_v14, 0 }
 0x1df   :  { %v2329_v61 = vshrl.u32 %v1081_v53, 30  ;;  %v868_v56 = vadd.s32 %v867_v60, %v863_v54  ;;  %vm2356_vm6 = vcmp.le.f32.partialorder %v1020_v31, 0.7853982  ;;  %vm810_vm7 = vcmp.lt.s32.totalorder %v2106_v49, 0 }
 0x1e0   :  { %v980_v20 = vsub.s32 %v976_v32, %v979_v57  ;;  %v864_v57 = vadd.s32 %v2304_v33, %v2311_v47  ;;  %v1002_v47 = vsub.s32 4, %v2320_v43  ;;  %vm2376_vm8 = vcmp.le.f32.partialorder %v808_v34, 0.7853982 }
 0x1e1   :  { %v1083_v38 = vshll.u32 %v2329_v61, 30  ;;  %v869_v3 = vadd.s32 536870912, %v868_v56  ;;  %vm1008_vm14 = vweird.f32 %v2094_v1 }
 0x1e2   :  { %v982_v35 = vsub.s32 0, %v980_v20 }
 0x1e3   :  { %v1084_v5 = vsub.s32 %v1080_v50, %v1083_v38  ;;  %v2332_v36 = vshrl.u32 %v869_v3, 30 }
 0x1e4   :  { %v1442_v58 = vmin.u32 %v982_v35, %v980_v20 }
 0x1e5   :  { %v1086_v10 = vsub.s32 0, %v1084_v5  ;;  %v871_v11 = vshll.u32 %v2332_v36, 30 }
 0x1e6   :  { %v984_v12 = vclz %v1442_v58 }
 0x1e7   :  { %v1446_v37 = vmin.u32 %v1086_v10, %v1084_v5  ;;  %v872_v13 = vsub.s32 %v868_v56, %v871_v11 }
 0x1e8   :  { %v1443_v7 = vadd.s32 4294967294, %v984_v12 }
 0x1e9   :  { %v1088_v62 = vclz %v1446_v37  ;;  %v874_v9 = vsub.s32 0, %v872_v13 }
 0x1ea   :  { %vm1444_vm15 = vcmp.lt.s32.totalorder %v1443_v7, 0 }
 0x1eb   :  { %v1447_v17 = vadd.s32 4294967294, %v1088_v62  ;;  %v987_v21 = vsel %vm1444_vm15, 0, %v1443_v7  ;;  %v1438_v15 = vmin.u32 %v874_v9, %v872_v13  ;;  %v1003_v9 = vsel %vm918_vm2, %v1002_v47, %v2320_v43 }
 0x1ec   :  { %v992_v23 = vsub.s32 4294967266, %v987_v21  ;;  %v988_v28 = vsub.s32 32, %v987_v21  ;;  %v989_v32 = vshll.u32 %v980_v20, %v987_v21 }
 0x1ed   :  { %vm1448_vm0 = vcmp.lt.s32.totalorder %v1447_v17, 0  ;;  %v876_v24 = vclz %v1438_v15  ;;  %v1005_v15 = vsel %vm2344_vm3, 0, %v1003_v9 }
 0x1ee   :  { %v1091_v26 = vsel %vm1448_vm0, 0, %v1447_v17  ;;  %v993_v6 = vadd.s32 127, %v992_v23  ;;  %v990_v0 = vshrl.u32 %v972_v27, %v988_v28  ;;  %v1106_v23 = vsub.s32 4, %v2329_v61 }
 0x1ef   :  { %v1096_v30 = vsub.s32 4294967266, %v1091_v26  ;;  %v1439_v8 = vadd.s32 4294967294, %v876_v24  ;;  %v1092_v41 = vsub.s32 32, %v1091_v26  ;;  %v1093_v51 = vshll.u32 %v1084_v5, %v1091_v26 }
 0x1f0   :  { %v994_v19 = vshll.u32 %v993_v6, 23  ;;  %v991_v45 = vor.u32 %v990_v0, %v989_v32  ;;  %v1009_v24 = vadd.s32 3, %v1005_v15  ;;  %v1107_v26 = vsel %vm1022_vm5, %v1106_v23, %v2329_v61 }
 0x1f1   :  { %v1097_v16 = vadd.s32 127, %v1096_v30  ;;  %vm1440_vm1 = vcmp.lt.s32.totalorder %v1439_v8, 0  ;;  %v1094_v29 = vshrl.u32 %v1076_v39, %v1092_v41  ;;  %v1109_v28 = vsel %vm2356_vm6, 0, %v1107_v26 }
 0x1f2   :  { %v995_v22 = vor.u32 4788187, %v994_v19  ;;  %v879_v50 = vsel %vm1440_vm1, 0, %v1439_v8  ;;  %v998_v52 = vcvt.s32.f32 %v991_v45  ;;  %v1010_v27 = vand.u32 3, %v1009_v24 }
 0x1f3   :  { %v1098_v4 = vshll.u32 %v1097_v16, 23  ;;  %v884_v18 = vsub.s32 4294967266, %v879_v50  ;;  %v1095_v53 = vor.u32 %v1094_v29, %v1093_v51  ;;  %v880_v60 = vsub.s32 32, %v879_v50 }
 0x1f4   :  { %v996_v25 = vand.u32 2147483647, %v995_v22  ;;  %v881_v38 = vshll.u32 %v872_v13, %v879_v50  ;;  %v894_v61 = vsub.s32 4, %v2332_v36  ;;  %v1113_v0 = vadd.s32 3, %v1109_v28 }
 0x1f5   :  { %v1099_v54 = vor.u32 4788187, %v1098_v4  ;;  %v885_v56 = vadd.s32 127, %v884_v18  ;;  %v1102_v20 = vcvt.s32.f32 %v1095_v53  ;;  %v882_v3 = vshrl.u32 %v864_v57, %v880_v60 }
 0x1f6   :  { %v999_v59 = vmul.f32 %v998_v52, %v996_v25  ;;  %vm1012_vm9 = vcmp.eq.s32.totalorder %v1010_v27, 0  ;;  %vm1015_vm10 = vcmp.eq.s32.totalorder %v1010_v27, 2  ;;  %v895_v29 = vsel %vm810_vm7, %v894_v61, %v2332_v36 }
 0x1f7   :  { %v1100_v2 = vand.u32 2147483647, %v1099_v54  ;;  %v886_v35 = vshll.u32 %v885_v56, 23  ;;  %v883_v10 = vor.u32 %v882_v3, %v881_v38  ;;  %v1114_v18 = vand.u32 3, %v1113_v0 }
 0x1f8   :  { %v1000_v58 = vxor.u32 2147483648, %v999_v59  ;;  %vm1011_vm11 = vcmp.lt.s32.totalorder %v1010_v27, 2  ;;  %v897_v53 = vsel %vm2376_vm8, 0, %v895_v29  ;;  %vm1112_vm0 = vweird.f32 %v2100_v14 }
 0x1f9   :  { %v1103_v5 = vmul.f32 %v1102_v20, %v1100_v2  ;;  %v887_v11 = vor.u32 4788187, %v886_v35  ;;  %v890_v62 = vcvt.s32.f32 %v883_v10  ;;  %vm1116_vm12 = vcmp.eq.s32.totalorder %v1114_v18, 0 }
 0x1fa   :  { %v1001_v33 = vsel %vm918_vm2, %v1000_v58, %v999_v59  ;;  %vm1119_vm13 = vcmp.eq.s32.totalorder %v1114_v18, 2  ;;  %v901_v59 = vadd.s32 3, %v897_v53  ;;  %vm1115_vm15 = vcmp.lt.s32.totalorder %v1114_v18, 2 }
 0x1fb   :  { %v1104_v37 = vxor.u32 2147483648, %v1103_v5  ;;  %v1004_v13 = vsel %vm2344_vm3, %v2094_v1, %v1001_v33  ;;  %v888_v7 = vand.u32 2147483647, %v887_v11  ;;  %vm900_vm3 = vweird.f32 %v2106_v49 }
 0x1fc   :  { %1641 = vcosq.f32 %v1004_v13  ;;  %v902_v10 = vand.u32 3, %v901_v59 }
 0x1fd   :  { %v1105_v17 = vsel %vm1022_vm5, %v1104_v37, %v1103_v5  ;;  %1643 = vsinq.f32 %v1004_v13  ;;  %v891_v21 = vmul.f32 %v890_v62, %v888_v7 }
 0x1fe   :  { %v1108_v43 = vsel %vm2356_vm6, %v2100_v14, %v1105_v17  ;;  %vm904_vm1 = vcmp.eq.s32.totalorder %v902_v10, 0  ;;  %vm907_vm2 = vcmp.eq.s32.totalorder %v902_v10, 2  ;;  %v2412_v14 = vld [vmem:[%s2618_s5] sm:$0xff] }
 0x1ff   :  { %1645 = vcosq.f32 %v1108_v43  ;;  %v892_v31 = vxor.u32 2147483648, %v891_v21  ;;  %v1179_v63 = vand.u32 2139095040, %v2412_v14 }
 0x200   :  { %1647 = vsinq.f32 %v1108_v43 }
 0x201   :  { %v893_v30 = vsel %vm810_vm7, %v892_v31, %v891_v21  ;;  %v1180_v17 = vshrl.u32 %v1179_v63, 23  ;;  %v2418_v21 = vld [vmem:[%s2618_s5 + $0x8] sm:$0xff]  ;;  %s1700_s5 = smov 112  }
 0x202   :  { %v896_v19 = vsel %vm2376_vm8, %v2106_v49, %v893_v30  ;;  %v1283_v49 = vand.u32 2139095040, %v2418_v21 }
 0x203   :  { %1649 = vcosq.f32 %v896_v19  ;;  %v1449_v15 = vadd.s32 4294967169, %v1180_v17 }
 0x204   :  { %1651 = vsinq.f32 %v896_v19  ;;  %v1284_v43 = vshrl.u32 %v1283_v49, 23 }
 0x205   :  { %v1186_v23 = vadd.s32 1, %v1449_v15 }
 0x206   :  { %v1642_v8 = vpop.eup %1641  ;;  %v1453_v31 = vadd.s32 4294967169, %v1284_v43 }
 0x207   :  { %v1644_v32 = vpop.eup %1643  ;;  %v1016_v45 = vxor.u32 2147483648, %v1642_v8  ;;  %vm1187_vm5 = vcmp.gt.s32.totalorder %v1186_v23, 0 }
 0x208   :  { %v1013_v16 = vxor.u32 2147483648, %v1644_v32  ;;  %v1188_v26 = vsel %vm1187_vm5, %v1186_v23, 0  ;;  %v1290_v28 = vadd.s32 1, %v1453_v31  ;;  %vm1178_vm5 = vcmp.lt.s32.totalorder %v2412_v14, 0 }
 0x209   :  { %v1646_v22 = vpop.eup %1645  ;;  %v1017_v52 = vsel %vm1015_vm10, %v1016_v45, %v1644_v32  ;;  %v1190_v30 = vand.u32 31, %v1188_v26 }
 0x20a   :  { %v1648_v4 = vpop.eup %1647  ;;  %v1014_v25 = vsel %vm1012_vm9, %v1642_v8, %v1013_v16  ;;  %v1120_v56 = vxor.u32 2147483648, %v1646_v22  ;;  %vm1291_vm6 = vcmp.gt.s32.totalorder %v1290_v28, 0  ;;  %v1176_v16 = vand.u32 2147483647, %v2412_v14 }
 0x20b   :  { %v1117_v60 = vxor.u32 2147483648, %v1648_v4  ;;  %v1018_v36 = vsel %vm1011_vm11, %v1014_v25, %v1017_v52  ;;  %v2423_v61 = vsub.s32 32, %v1190_v30  ;;  %v1292_v45 = vsel %vm1291_vm6, %v1290_v28, 0 }
 0x20c   :  { %v1121_v38 = vsel %vm1119_vm13, %v1120_v56, %v1648_v4  ;;  %v1019_v35 = vsel %vm1008_vm14, nan, %v1018_v36  ;;  %v1294_v52 = vand.u32 31, %v1292_v45  ;;  %v1183_v53 = vand.u32 8388607, %v1176_v16 }
 0x20d   :  { %v1118_v20 = vsel %vm1116_vm12, %v1646_v22, %v1117_v60  ;;  %v1650_v3 = vpop.eup %1649  ;;  %v1124_v11 = vmul.f32 0.8, %v1019_v35  ;;  %v1203_v29 = vshrl.u32 %v1694_v48, %v2423_v61  ;;  %v1194_v60 = vshrl.u32 %v1691_v42, %v2423_v61 }
 0x20e   :  { %v1652_v58 = vpop.eup %1651  ;;  %v1122_v5 = vsel %vm1115_vm15, %v1118_v20, %v1121_v38  ;;  %v908_v47 = vxor.u32 2147483648, %v1650_v3  ;;  %v1205_v36 = vshll.u32 %v1694_v48, %v1190_v30  ;;  %v1206_v59 = vshrl.u32 %v1695_v55, %v2423_v61 }
 0x20f   :  { %v1123_v12 = vsel %vm1112_vm0, nan, %v1122_v5  ;;  %v905_v33 = vxor.u32 2147483648, %v1652_v58  ;;  %v1197_v20 = vshrl.u32 %v1692_v44, %v2423_v61  ;;  %v1199_v38 = vshll.u32 %v1692_v44, %v1190_v30 }
 0x210   :  { %v1125_v1 = vmul.f32 0.8, %v1123_v12  ;;  %v909_v13 = vsel %vm907_vm2, %v908_v47, %v1652_v58  ;;  %v2449_v5 = vsub.s32 32, %v1294_v52  ;;  %v1297_v15 = vshll.u32 %v1690_v40, %v1294_v52 }
 0x211   :  { %v906_v37 = vsel %vm904_vm1, %v1650_v3, %v905_v33  ;;  %v1200_v3 = vshrl.u32 %v1693_v46, %v2423_v61  ;;  %v1300_v23 = vshll.u32 %v1691_v42, %v1294_v52  ;;  %vm2576_vm6 = vcmp.le.f32.partialorder %v1176_v16, 0.7853982 }
 0x212   :  { %v2421_v24 = vpop.permute.xlu1 %1136  ;;  %v1310_v63 = vshrl.u32 %v1695_v55, %v2449_v5  ;;  %v1298_v49 = vshrl.u32 %v1691_v42, %v2449_v5  ;;  %v1301_v31 = vshrl.u32 %v1692_v44, %v2449_v5  ;;  %v1304_v55 = vshrl.u32 %v1693_v46, %v2449_v5 }
 0x213   :  { %v1201_v47 = vor.u32 %v1200_v3, %v1199_v38 }
 0x2a2   :  { %v2386_v39 = vpop.f32.mrb[0].mxu0 }
 0x2a3   :  { %v2388_v41 = vpop.f32.mrb[1].mxu0  ;;  %v683_v34 = vsel %vm320_vm4, %v2386_v39, 0.0  ;;  %v687_v51 = vmul.f32 %v2386_v39, %v2386_v39 }
 0x2a4   :  { %684 = vadd.xlane.f32.xlu1 %v683_v34  ;;  %v680_v50 = vsel %vm320_vm4, %v2388_v41, 0.0  ;;  %v686_v54 = vmul.f32 %v2388_v41, %v2388_v41 }
 0x2a5   :  { %681 = vadd.xlane.f32.xlu0 %v680_v50  ;;  %v691_v57 = vsel %vm320_vm4, %v687_v51, 0.0  ;;  %v1202_v51 = vshll.u32 %v1693_v46, %v1190_v30 }
 0x2a6   :  { %v688_v2 = vsel %vm320_vm4, %v686_v54, 0.0  ;;  %vm903_vm4 = vcmp.lt.s32.totalorder %v902_v10, 2  ;;  %v2435_v54 = vshrl.u32 %v1188_v26, 5  ;;  %v1184_v10 = vor.u32 8388608, %v1183_v53 }
 0x2a7   :  { %v910_v7 = vsel %vm903_vm4, %v906_v37, %v909_v13  ;;  %v1204_v58 = vor.u32 %v1203_v29, %v1202_v51  ;;  %v1306_v37 = vshll.u32 %v1693_v46, %v1294_v52  ;;  %v1307_v13 = vshrl.u32 %v1694_v48, %v2449_v5 }
 0x2a8   :  { %v911_v62 = vsel %vm900_vm3, nan, %v910_v7  ;;  %vm1211_vm7 = vcmp.lt.s32.totalorder %v2435_v54, 4  ;;  %vm1208_vm8 = vcmp.lt.s32.totalorder %v2435_v54, 1  ;;  %vm1210_vm9 = vcmp.lt.s32.totalorder %v2435_v54, 3 }
 0x2a9   :  { %692 = vadd.xlane.f32.xlu0 %v691_v57  ;;  %v913_v9 = vmul.f32 0.8, %v911_v62  ;;  %v1193_v57 = vshll.u32 %v1690_v40, %v1190_v30  ;;  %v1280_v7 = vand.u32 2147483647, %v2418_v21  ;;  %v2464_v62 = vshrl.u32 %v1292_v45, 5 }
 0x2aa   :  { %vm1209_vm10 = vcmp.lt.s32.totalorder %v2435_v54, 2  ;;  %v1299_v45 = vor.u32 %v1298_v49, %v1297_v15  ;;  %v1213_v3 = vsel %vm1211_vm7, %v1201_v47, 2102212464  ;;  %v1296_v49 = vshrl.u32 %v1690_v40, %v2449_v5 }
 0x2ab   :  { %v2452_v12 = vor.u32 %v1194_v60, %v1193_v57  ;;  %vm1315_vm11 = vcmp.lt.s32.totalorder %v2464_v62, 4  ;;  %vm1312_vm12 = vcmp.lt.s32.totalorder %v2464_v62, 1  ;;  %vm1314_vm13 = vcmp.lt.s32.totalorder %v2464_v62, 3 }
 0x2ac   :  { %vm1313_vm14 = vcmp.lt.s32.totalorder %v2464_v62, 2 }
 0x2ad   :  { %689 = vadd.xlane.f32.xlu0 %v688_v2  ;;  %v1196_v2 = vshll.u32 %v1691_v42, %v1190_v30 }
 0x2af   :  { %v2454_v33 = vor.u32 %v1197_v20, %v1196_v2 }
 0x2b5   :  { %1148 = vperm.xlu1 %1623, %v1124_v11   ;;  %v1207_v11 = vor.u32 %v1206_v59, %v1205_v36 }
 0x2b7   :  { %v1221_v17 = vsel %vm1211_vm7, %v1207_v11, 1326507024 }
 0x2b9   :  { %1153 = vperm.xlu1 %1623, %v1125_v1   ;;  %v1217_v1 = vsel %vm1211_vm7, %v1204_v58, 920167782  ;;  %vm1282_vm7 = vcmp.lt.s32.totalorder %v2418_v21, 0 }
 0x2ba   :  { %v1218_v42 = vsel %vm1210_vm9, %v1201_v47, %v1217_v1 }
 0x2c3   :  { %1141 = vperm.xlu0 %1624, %v913_v9   ;;  %v1309_v9 = vshll.u32 %v1694_v48, %v1294_v52  ;;  %v1303_v48 = vshll.u32 %v1692_v44, %v1294_v52 }
 0x2c5   :  { %v1311_v44 = vor.u32 %v1310_v63, %v1309_v9 }
 0x331   :  { %v685_v27 = vpop.xlane.xlu1 %684 }
 0x332   :  { %v682_v6 = vpop.xlane.xlu0 %681  ;;  %v695_v8 = vmul.f32 0.03125, %v685_v27  ;;  %v1216_v27 = vsel %vm1208_vm8, %v2452_v12, %v2454_v33 }
 0x333   :  { %v2425_v19 = vmul.f32 0.03125, %v682_v6  ;;  %v1287_v6 = vand.u32 8388607, %v1280_v7  ;;  %v1219_v29 = vsel %vm1209_vm10, %v1216_v27, %v1218_v42 }
 0x334   :  { %v699_v0 = vmul.f32 %v695_v8, %v695_v8  ;;  %v1127_v43 = vsub.f32 %v2386_v39, %v695_v8  ;;  %v1308_v39 = vor.u32 %v1307_v13, %v1306_v37  ;;  %v1220_v8 = vsel %vm1208_vm8, %v2454_v33, %v1201_v47 }
 0x335   :  { %v698_v4 = vmul.f32 %v2425_v19, %v2425_v19  ;;  %v1149_v46 = vpop.permute.xlu1 %1148  ;;  %v1288_v52 = vor.u32 8388608, %v1287_v6  ;;  %v1214_v47 = vsel %vm1210_vm9, %v2454_v33, %v1213_v3 }
 0x336   :  { %v693_v32 = vpop.xlane.xlu0 %692 }
 0x337   :  { %v697_v34 = vmul.f32 0.03125, %v693_v32  ;;  %v1222_v32 = vsel %vm1210_vm9, %v1204_v58, %v1221_v17 }
 0x338   :  { %v1223_v53 = vsel %vm1209_vm10, %v1220_v8, %v1222_v32 }
 0x339   :  { %v701_v22 = vsub.f32 %v697_v34, %v699_v0  ;;  %v1224_v0 = vshll.u32 %v1184_v10, 8  ;;  %v1126_v34 = vsub.f32 %v2388_v41, %v2425_v19  ;;  %v1325_v41 = vsel %vm1315_vm11, %v1311_v44, 1326507024  ;;  %v1154_v36 = vpop.permute.xlu1 %1153 }
 0x33a   :  { %v690_v50 = vpop.xlane.xlu0 %689  ;;  %v1192_v19 = vshrl.u32 %v1690_v40, %v2423_v61  ;;  %v1326_v20 = vsel %vm1314_vm13, %v1308_v39, %v1325_v41  ;;  %v1316_v40 = vsel %vm1312_vm12, %v1296_v49, %v1299_v45 }
 0x33b   :  { %v1129_v18 = vadd.f32 1e-05, %v701_v22  ;;  %v696_v25 = vmul.f32 0.03125, %v690_v50  ;;  %v1302_v22 = vor.u32 %v1301_v31, %v1300_v23  ;;  %v1305_v50 = vor.u32 %v1304_v55, %v1303_v48 }
 0x33c   :  { %v2516_v59 = vmul.u32.u64.low %v1224_v0, %v1219_v29  ;;  %v2517_v2 = vmul.u32.u64.high %v1224_v0, %v1219_v29, %v2516_v59  ;;  %v2526_v58 = vmul.u32.u64.low %v1224_v0, %v1223_v53  ;;  %v2527_v10 = vmul.u32.u64.high %v1224_v0, %v1223_v53, %v2526_v58 }
 0x33d   :  { %1653 = vrsqrt.f32 %v1129_v18  ;;  %v700_v56 = vsub.f32 %v696_v25, %v698_v4  ;;  %v1321_v4 = vsel %vm1315_vm11, %v1308_v39, 920167782  ;;  %v1320_v60 = vsel %vm1312_vm12, %v1299_v45, %v1302_v22 }
 0x33e   :  { %v1324_v61 = vsel %vm1312_vm12, %v1302_v22, %v1305_v50  ;;  %v1212_v13 = vsel %vm1208_vm8, %v1192_v19, %v2452_v12  ;;  %v1317_v12 = vsel %vm1315_vm11, %v1305_v50, 2102212464  ;;  %v1234_v48 = vadd.s32 1, %v2517_v2 }
 0x33f   :  { %v1128_v35 = vadd.f32 1e-05, %v700_v56  ;;  %v1322_v56 = vsel %vm1314_vm13, %v1305_v50, %v1321_v4  ;;  %v1327_v37 = vsel %vm1313_vm14, %v1324_v61, %v1326_v20  ;;  %v1215_v31 = vsel %vm1209_vm10, %v1212_v13, %v1214_v47 }
 0x340   :  { %v1323_v11 = vsel %vm1313_vm14, %v1320_v60, %v1322_v56  ;;  %vm1233_vm1 = vc.u32 %v2527_v10, %v2516_v59  ;;  %v1318_v5 = vsel %vm1314_vm13, %v1302_v22, %v1317_v12  ;;  %v1231_v55 = vmul.u32 %v1224_v0, %v1215_v31 }
 0x341   :  { %1655 = vrsqrt.f32 %v1128_v35  ;;  %v1328_v35 = vshll.u32 %v1288_v52, 8  ;;  %v1319_v54 = vsel %vm1313_vm14, %v1316_v40, %v1318_v5  ;;  %v1232_v53 = vadd.s32 %v2516_v59, %v2527_v10 }
 0x342   :  { %v1142_v30 = vpop.permute.xlu0 %1141  ;;  %vm2586_vm8 = vcmp.le.f32.partialorder %v1280_v7, 0.7853982  ;;  %vm1268_vm14 = vweird.f32 %v2412_v14 }
 0x343   :  { %v2541_v17 = vmul.u32.u64.low %v1328_v35, %v1323_v11  ;;  %v2542_v15 = vmul.u32.u64.high %v1328_v35, %v1323_v11, %v2541_v17  ;;  %v1335_v39 = vmul.u32 %v1328_v35, %v1319_v54 }
 0x345   :  { %v1338_v27 = vadd.s32 1, %v2542_v15 }
 0x347   :  { %v1654_v26 = vpop.eup %1653 }
 0x348   :  { %v1133_v28 = vmul.f32 %v1654_v26, %v1127_v43  ;;  %v2547_v23 = vmul.u32.u64.low %v1328_v35, %v1327_v37  ;;  %v2548_v43 = vmul.u32.u64.high %v1328_v35, %v1327_v37, %v2547_v23  ;;  %v1235_v26 = vsel %vm1233_vm1, %v1234_v48, %v2517_v2 }
 0x349   :  { %v1236_v42 = vadd.s32 %v1235_v26, %v1231_v55  ;;  %vm1388_vm1 = vcmask 130048  }
 0x34a   :  { %v1145_v18 = vmul.f32 %v1142_v30, %v1133_v28  ;;  %vm1337_vm2 = vc.u32 %v2548_v43, %v2541_v17  ;;  %v1336_v20 = vadd.s32 %v2541_v17, %v2548_v43 }
 0x34b   :  { %v1656_v51 = vpop.eup %1655  ;;  %v1339_v28 = vsel %vm1337_vm2, %v1338_v27, %v2542_v15  ;;  %v1237_v6 = vadd.s32 536870912, %v1236_v42  ;;  %vm1403_vm2 = vcmask 0  }
 0x34c   :  { %v1132_v25 = vmul.f32 %v1656_v51, %v1126_v34  ;;  %v1340_v44 = vadd.s32 %v1339_v28, %v1335_v39 }
 0x34e   :  { %v1144_v57 = vmul.f32 %v2421_v24, %v1132_v25  ;;  %v1157_v24 = vadd.f32 %v1154_v36, %v1145_v18  ;;  %v1341_v30 = vadd.s32 536870912, %v1340_v44 }
 0x350   :  { %v1156_v38 = vadd.f32 %v1149_v46, %v1144_v57  ;;  %v1161_v63 = vmul.f32 0.2, %v1157_v24  ;;  %vm1159_vm0 = vcmp.gt.f32.partialorder %v1157_v24, 0.0  ;;  %v1238_v46 = vshrl.u32 %v1237_v6, 30 }
 0x351   :  { %v1342_v32 = vshrl.u32 %v1341_v30, 30 }
 0x352   :  { %vm1158_vm15 = vcmp.gt.f32.partialorder %v1156_v38, 0.0  ;;  %v1160_v1 = vmul.f32 0.2, %v1156_v38  ;;  %v2552_v33 = vsel %vm1159_vm0, %v1157_v24, %v1161_v63  ;;  %v1239_v8 = vshll.u32 %v1238_v46, 30 }
 0x353   :  { %v1343_v34 = vshll.u32 %v1342_v32, 30  ;;  %v1262_v31 = vsub.s32 4, %v1238_v46  ;;  %v1366_v55 = vsub.s32 4, %v1342_v32  ;;  %vm1372_vm0 = vweird.f32 %v2418_v21 }
 0x354   :  { %v2539_v9 = vsel %vm1158_vm15, %v1156_v38, %v1160_v1  ;;  %v1240_v0 = vsub.s32 %v1236_v42, %v1239_v8 }
 0x355   :  { %1166 = vrot.lane.b32.xlu1 %v2539_v9, %s1700_s5  ;;  %v1344_v22 = vsub.s32 %v1340_v44, %v1343_v34  ;;  %v1263_v16 = vsel %vm1178_vm5, %v1262_v31, %v1238_v46  ;;  %v1367_v27 = vsel %vm1282_vm7, %v1366_v55, %v1342_v32 }
 0x356   :  { %v1242_v45 = vsub.s32 0, %v1240_v0  ;;  %v1265_v54 = vsel %vm2576_vm6, 0, %v1263_v16  ;;  %v1369_v7 = vsel %vm2586_vm8, 0, %v1367_v27 }
 0x357   :  { %v1346_v50 = vsub.s32 0, %v1344_v22  ;;  %v1269_v42 = vadd.s32 3, %v1265_v54  ;;  %v1373_v44 = vadd.s32 3, %v1369_v7 }
 0x358   :  { %v1450_v62 = vmin.u32 %v1242_v45, %v1240_v0 }
 0x359   :  { %1168 = vrot.lane.b32.xlu1 %v2552_v33, %s1700_s5  ;;  %v1454_v29 = vmin.u32 %v1346_v50, %v1344_v22  ;;  %v1270_v6 = vand.u32 3, %v1269_v42  ;;  %v1374_v34 = vand.u32 3, %v1373_v44 }
 0x35a   :  { %v1244_v51 = vclz %v1450_v62 }
 0x35b   :  { %v1348_v18 = vclz %v1454_v29  ;;  %vm1272_vm9 = vcmp.eq.s32.totalorder %v1270_v6, 0  ;;  %vm1275_vm10 = vcmp.eq.s32.totalorder %v1270_v6, 2  ;;  %vm1271_vm11 = vcmp.lt.s32.totalorder %v1270_v6, 2 }
 0x35c   :  { %v1451_v4 = vadd.s32 4294967294, %v1244_v51  ;;  %vm1376_vm12 = vcmp.eq.s32.totalorder %v1374_v34, 0  ;;  %vm1379_vm13 = vcmp.eq.s32.totalorder %v1374_v34, 2  ;;  %vm1375_vm15 = vcmp.lt.s32.totalorder %v1374_v34, 2 }
 0x35d   :  { %v1455_v25 = vadd.s32 4294967294, %v1348_v18 }
 0x35e   :  { %vm1452_vm4 = vcmp.lt.s32.totalorder %v1451_v4, 0 }
 0x35f   :  { %v1247_v52 = vsel %vm1452_vm4, 0, %v1451_v4  ;;  %vm1456_vm3 = vcmp.lt.s32.totalorder %v1455_v25, 0 }
 0x360   :  { %v1252_v41 = vsub.s32 4294967266, %v1247_v52  ;;  %v1351_v19 = vsel %vm1456_vm3, 0, %v1455_v25  ;;  %v1248_v57 = vsub.s32 32, %v1247_v52  ;;  %v1249_v36 = vshll.u32 %v1240_v0, %v1247_v52 }
 0x361   :  { %v1356_v56 = vsub.s32 4294967266, %v1351_v19  ;;  %v1352_v24 = vsub.s32 32, %v1351_v19  ;;  %v1353_v58 = vshll.u32 %v1344_v22, %v1351_v19 }
 0x362   :  { %v1253_v60 = vadd.s32 127, %v1252_v41  ;;  %v1250_v2 = vshrl.u32 %v1232_v53, %v1248_v57 }
 0x363   :  { %v1357_v38 = vadd.s32 127, %v1356_v56  ;;  %v1354_v11 = vshrl.u32 %v1336_v20, %v1352_v24 }
 0x364   :  { %v1254_v61 = vshll.u32 %v1253_v60, 23  ;;  %v1251_v3 = vor.u32 %v1250_v2, %v1249_v36 }
 0x365   :  { %v1358_v1 = vshll.u32 %v1357_v38, 23  ;;  %v1355_v47 = vor.u32 %v1354_v11, %v1353_v58 }
 0x366   :  { %v1255_v35 = vor.u32 4788187, %v1254_v61  ;;  %v1258_v13 = vcvt.s32.f32 %v1251_v3 }
 0x367   :  { %v1359_v63 = vor.u32 4788187, %v1358_v1  ;;  %v1362_v15 = vcvt.s32.f32 %v1355_v47 }
 0x368   :  { %v1256_v37 = vand.u32 2147483647, %v1255_v35 }
 0x369   :  { %v1360_v10 = vand.u32 2147483647, %v1359_v63 }
 0x36a   :  { %v1259_v59 = vmul.f32 %v1258_v13, %v1256_v37 }
 0x36b   :  { %v1363_v23 = vmul.f32 %v1362_v15, %v1360_v10 }
 0x36c   :  { %v1260_v49 = vxor.u32 2147483648, %v1259_v59 }
 0x36d   :  { %v1364_v12 = vxor.u32 2147483648, %v1363_v23 }
 0x36e   :  { %v1261_v43 = vsel %vm1178_vm5, %v1260_v49, %v1259_v59 }
 0x36f   :  { %v1264_v48 = vsel %vm2576_vm6, %v2412_v14, %v1261_v43  ;;  %v1365_v5 = vsel %vm1282_vm7, %v1364_v12, %v1363_v23 }
 0x370   :  { %1657 = vcosq.f32 %v1264_v48  ;;  %v1368_v26 = vsel %vm2586_vm8, %v2418_v21, %v1365_v5 }
 0x371   :  { %1659 = vsinq.f32 %v1264_v48 }
 0x372   :  { %1661 = vcosq.f32 %v1368_v26 }
 0x373   :  { %1663 = vsinq.f32 %v1368_v26 }
 0x37a   :  { %v1658_v39 = vpop.eup %1657 }
 0x37b   :  { %v1660_v28 = vpop.eup %1659  ;;  %v1276_v8 = vxor.u32 2147483648, %v1658_v39 }
 0x37c   :  { %v1662_v46 = vpop.eup %1661  ;;  %v1273_v30 = vxor.u32 2147483648, %v1660_v28 }
 0x37d   :  { %v1664_v0 = vpop.eup %1663  ;;  %v1277_v22 = vsel %vm1275_vm10, %v1276_v8, %v1660_v28  ;;  %v1380_v62 = vxor.u32 2147483648, %v1662_v46 }
 0x37e   :  { %v1274_v45 = vsel %vm1272_vm9, %v1658_v39, %v1273_v30  ;;  %v1377_v32 = vxor.u32 2147483648, %v1664_v0 }
 0x37f   :  { %v1278_v50 = vsel %vm1271_vm11, %v1274_v45, %v1277_v22  ;;  %v1381_v29 = vsel %vm1379_vm13, %v1380_v62, %v1664_v0 }
 0x380   :  { %v1378_v51 = vsel %vm1376_vm12, %v1662_v46, %v1377_v32  ;;  %v1279_v4 = vsel %vm1268_vm14, nan, %v1278_v50 }
 0x381   :  { %v1382_v18 = vsel %vm1375_vm15, %v1378_v51, %v1381_v29  ;;  %v1384_v25 = vmul.f32 0.8, %v1279_v4 }
 0x382   :  { %v1383_v41 = vsel %vm1372_vm0, nan, %v1382_v18 }
 0x383   :  { %v1385_v57 = vmul.f32 0.8, %v1383_v41 }
 0x3c7   :  { %v1167_v52 = vpop.permute.xlu1 %1166 }
 0x3c8   :  { %v1172_v19 = vadd.f32 %v1167_v52, %v2539_v9 }
 0x3ca   :  { %v1386_v53 = vmul.f32 %v1384_v25, %v1172_v19 }
 0x3cb   :  { %v1169_v60 = vpop.permute.xlu1 %1168 }
 0x3cc   :  { %v1173_v56 = vadd.f32 %v1169_v60, %v2552_v33  ;;  %v1389_v14 = vsel %vm1388_vm1, %v1386_v53, 0.0 }
 0x3cd   :  { %1390 = vadd.xlane.f32.xlu1 %v1389_v14 }
 0x3ce   :  { %v1387_v36 = vmul.f32 %v1385_v57, %v1173_v56 }
 0x3d0   :  { %v1392_v2 = vsel %vm1388_vm1, %v1387_v36, 0.0 }
 0x3d1   :  { %1393 = vadd.xlane.f32.xlu0 %v1392_v2 }
 0x45a   :  { %v1391_v61 = vpop.xlane.xlu1 %1390 }
 0x45e   :  { %v1394_v20 = vpop.xlane.xlu0 %1393 }
 0x45f   :  { %v1395_v21 = vadd.f32 %v1394_v20, %v1391_v61 }
 0x461   :  { %v1396_v24 = vrot.slane %v1395_v21, 4 }
 0x463   :  { %v1397_v38 = vadd.f32 %v1396_v24, %v1395_v21 }
 0x465   :  { %v1398_v3 = vrot.slane %v1397_v38, 2 }
 0x467   :  { %v1399_v35 = vadd.f32 %v1398_v3, %v1397_v38 }
 0x469   :  { %v1400_v58 = vrot.slane %v1399_v35, 1 }
 0x46b   :  { %v1401_v9 = vadd.f32 %v1400_v58, %v1399_v35 }
 0x46d   :  { %v1402_v11 = vmul.f32 0.5, %v1401_v9 }
 0x46f   :  { %1404 = vst.msk [vmem:[#allocation3] sm:$0x1] %vm1403_vm2, %v1402_v11 }
 0x470   :  { %1676 = shalt.err (!%p1673_p4)
}
 0x471   :  { %s1677_s9 = scalar_lea.hbm %s2619_s6, 16 }
 0x472   :  { %p1678_p5 = scmp.ne.s32.totalorder %s2619_s6, %s1677_s9  ;;  %p1681_p6 = scmp.lt.u32.totalorder %s1677_s9, %s2619_s6 }
 0x474   :  { %p1683_p7 = pnand %p1681_p6, %p1678_p5 }
 0x476   :  { %1686 = shalt.err (!%p1683_p7)
}
 0x477   :  { %1414 = dma.vmem_to_hbm [thread:$0]  %s1412_s29, 16, %s2619_s6, [#allocation4]  }
 0x478   :  { %1687 = dma.done.wait [#allocation4], 16  }
 0x479   :  { %1688 = vsyncadd [#allocation4], 4294967280 }
 0x47a   :  { %1418 = vsyncpa [#allocation4], 1 }

</bundles_post_ra>
